<compile_context>
chip_gen: v7x
topology: tpu7x:2x2x1
jax: 0.10.0
libtpu: 0.0.40
codegen_flags: <defaults>
</compile_context>

<pallas_src>
import math
import jax
import jax.numpy as jnp
from jax.experimental import pallas as pl
from jax.experimental.pallas import tpu as pltpu

# ---------------- config (small, deterministic, consistent with the module) ------------
HIDDEN = 32                                    # config.hidden_size
HEADS = 2                                      # config.num_attention_heads
DIM_HEAD = HIDDEN // HEADS                     # 16
NB_FEATURES = int(DIM_HEAD * math.log(DIM_HEAD))   # performer default nb_features = 44
PP = 128                                       # packed feature lanes (2*44 padded to 128)
DEPTH = 2                                      # config.num_hidden_layers
MAX_POS = 16                                   # config.max_position_embeddings
LN_EPS = 1e-12                                 # config.layer_norm_eps (outer LayerNorm)
PRE_LN_EPS = 1e-5                              # performer PreLayerNorm (nn.LayerNorm default)
INIT_RANGE = 0.02                              # config.initializer_range
FF_MULT = 4                                    # performer FeedForward default mult
KERNEL_EPS = 1e-4                              # performer softmax_kernel eps
NEG_BIG = -1e30

B = 2
S = 8
N = B * S                                      # 16 rows = two full f32 sublane groups

MM_DTYPE = jnp.bfloat16                        # MXU operand dtype (f32 restores full parity)
SLAB_LANES = 128

# -------- matmul-weight slab row layout (every block zero-padded to 128 lanes) ----------
W_QKV = 0                                      # (H rows,  lanes 0:3H)
W_P = HIDDEN                                   # (H rows,  lanes 0:PP)   FAVOR+ projection
W_O = 2 * HIDDEN                               # (H rows,  lanes 0:H)
W_1 = 3 * HIDDEN                               # (H rows,  lanes 0:4H)
W_2 = 4 * HIDDEN                               # (4H rows, lanes 0:H)
W_PER_LAYER = 4 * HIDDEN + FF_MULT * HIDDEN    # 256 rows / layer
W_PW1 = DEPTH * W_PER_LAYER                    # pooler fc1 weight (H rows, lanes 0:H)
W_ROWS = W_PW1 + HIDDEN                        # 544

# -------- row-vector-param slab row layout ----------------------------------------------
V_ELN_G, V_ELN_B = 0, 1
V_LAYER0 = 2
V_ALN_G, V_ALN_B, V_BQKV, V_BO, V_FLN_G, V_FLN_B, V_B1, V_B2 = range(8)
V_PER_LAYER = 8
V_PB1 = V_LAYER0 + DEPTH * V_PER_LAYER
V_PW2 = V_PB1 + 1
V_PB2 = V_PW2 + 1
V_POS = V_PB2 + 1                              # pre-tiled positions, N rows
V_ROWS = V_POS + N                             # 37

# -------- constant structure-mask slab row layout ----------------------------------------
C_CMASK = 0                                    # (HEADS rows, lanes 0:PP) per-head feature cols
C_WSQ = C_CMASK + HEADS                        # (H rows,     lanes 0:PP) dim->head-feature ones
C_VHEAD = C_WSQ + HIDDEN                       # (HEADS rows, lanes 0:H)  per-head output cols
C_BB = C_VHEAD + HEADS                         # (N rows,     lanes 0:N)  block-diag batch mask
C_BSEL = C_BB + N                              # (B rows,     lanes 0:N)  batch row-selector
C_ROWSEL = C_BSEL + B                          # (N rows,     lanes 0:B)  row -> batch one-hot
C_ROWS = C_ROWSEL + N                          # 70


# ---------------- in-kernel helpers ----------------------------------------------------
def _layernorm(x, gamma, beta, eps):
    mu = jnp.mean(x, axis=-1, keepdims=True)
    var = jnp.mean((x - mu) ** 2, axis=-1, keepdims=True)
    return (x - mu) * jax.lax.rsqrt(var + eps) * gamma + beta


def _mm(a, b):
    # MXU matmul; operands bf16, accumulate f32.
    return jnp.dot(a.astype(MM_DTYPE), b.astype(MM_DTYPE),
                   preferred_element_type=jnp.float32)


def _mm_rt(a, b):
    # a @ b.T  (contract the lane dim of both operands).
    return jax.lax.dot_general(a.astype(MM_DTYPE), b.astype(MM_DTYPE),
                               (((1,), (1,)), ((), ())),
                               preferred_element_type=jnp.float32)


# ---------------- fused kernel ----------------------------------------------------------
def fused_kernel(x_ref, mask_ref, wm_ref, vp_ref, cm_ref, o_ref):
    dn = DIM_HEAD ** -0.25                       # FAVOR+ data_normalizer
    ratio = NB_FEATURES ** -0.5

    def vrow(r, w=HIDDEN):                       # static row-vector param load -> (1, w)
        return vp_ref[r:r + 1, 0:w]

    # static structure constants (loaded once, reused every layer)
    cmask = cm_ref[C_CMASK:C_CMASK + HEADS, 0:PP]       # (HEADS, PP)
    wsq = cm_ref[C_WSQ:C_WSQ + HIDDEN, 0:PP]            # (H, PP)
    vhead = cm_ref[C_VHEAD:C_VHEAD + HEADS, 0:HIDDEN]   # (HEADS, H)
    bb = cm_ref[C_BB:C_BB + N, 0:N]                     # (N, N) block-diag batch mask
    bsel = cm_ref[C_BSEL:C_BSEL + B, 0:N]               # (B, N)
    rowsel = cm_ref[C_ROWSEL:C_ROWSEL + N, 0:B]         # (N, B)

    mask = mask_ref[...]                                # (N, 1)
    pos = vp_ref[V_POS:V_POS + N, 0:HIDDEN]             # pre-tiled positions (N, H)

    # ---- embeddings = LayerNorm(input_embs + position_embeddings); dropout = identity ----
    x = _layernorm(x_ref[...] + pos, vrow(V_ELN_G), vrow(V_ELN_B), LN_EPS)

    for l in range(DEPTH):
        wb = l * W_PER_LAYER
        vb = V_LAYER0 + l * V_PER_LAYER

        # ======== half 1: x = x + SelfAttention(PreLayerNorm(x))  (FAVOR+) ========
        xn = _layernorm(x, vrow(vb + V_ALN_G), vrow(vb + V_ALN_B), PRE_LN_EPS)
        qkv = _mm(xn, wm_ref[wb + W_QKV: wb + W_QKV + HIDDEN, 0:3 * HIDDEN]) \
            + vrow(vb + V_BQKV, 3 * HIDDEN)
        q = qkv[:, 0:HIDDEN] * dn                        # data_normalizer folded in
        k = qkv[:, HIDDEN:2 * HIDDEN] * dn
        v = qkv[:, 2 * HIDDEN:3 * HIDDEN]

        wp = wm_ref[wb + W_P: wb + W_P + HIDDEN, 0:PP]   # block-diag proj^T, zero-padded
        qd = _mm(q, wp)                                  # (N, PP) random-feature logits
        kd = _mm(k, wp)
        qdiag = 0.5 * _mm(q * q, wsq)                    # 0.5*||q_h||^2 broadcast per head
        kdiag = 0.5 * _mm(k * k, wsq)

        # softmax_kernel maxes: per-row/head for queries, per-(batch, head) for keys
        qmax = 0.0
        kmax = 0.0
        for h in range(HEADS):
            cm = cmask[h:h + 1, :]
            qmax = qmax + cm * jnp.max(jnp.where(cm > 0.5, qd, NEG_BIG),
                                       axis=-1, keepdims=True)
            kmasked = jnp.where(cm > 0.5, kd, NEG_BIG)
            krow = 0.0
            for b in range(B):                           # cheap scalar reductions only
                blk = kmasked[b * S:(b + 1) * S, :]      # sublane-aligned static slice
                m_bh = jnp.max(jnp.max(blk, axis=-1, keepdims=True),
                               axis=0, keepdims=True)    # (1, 1)
                krow = krow + rowsel[:, b:b + 1] * m_bh
            kmax = kmax + cm * krow
        qp = ratio * (jnp.exp(qd - qdiag - qmax) + KERNEL_EPS)   # (N, PP) lane-dense
        kp = ratio * (jnp.exp(kd - kdiag - kmax) + KERNEL_EPS)

        # non-causal linear attention; batch isolation via the (N,N) block-diagonal mask,
        # head isolation via per-head feature/output masks -> no per-batch loop, no concats.
        attn = jnp.zeros((N, HIDDEN), jnp.float32)
        for h in range(HEADS):
            a = _mm_rt(qp * cmask[h:h + 1, :], kp) * bb           # (N, N)
            denom = jnp.sum(a, axis=-1, keepdims=True)            # (N, 1)
            num = _mm(a, v)                                       # (N, H)
            attn = attn + num * pl.reciprocal(denom, approx=True) * vhead[h:h + 1, :]
        x = x + _mm(attn, wm_ref[wb + W_O: wb + W_O + HIDDEN, 0:HIDDEN]) + vrow(vb + V_BO)

        # ======== half 2: x = x + FeedForward(PreLayerNorm(x)) ========
        xn = _layernorm(x, vrow(vb + V_FLN_G), vrow(vb + V_FLN_B), PRE_LN_EPS)
        h1 = _mm(xn, wm_ref[wb + W_1: wb + W_1 + HIDDEN, 0:FF_MULT * HIDDEN]) \
            + vrow(vb + V_B1, FF_MULT * HIDDEN)
        h1 = jax.nn.gelu(h1, approximate=True)           # tanh-GELU (~1e-3 vs erf-GELU)
        x = x + _mm(h1, wm_ref[wb + W_2: wb + W_2 + FF_MULT * HIDDEN, 0:HIDDEN]) \
            + vrow(vb + V_B2)

    # ---- AttentionPooling: alpha = exp(fc2(tanh(fc1(x)))) * mask; normalize; x^T alpha ----
    e = jnp.tanh(_mm(x, wm_ref[W_PW1:W_PW1 + HIDDEN, 0:HIDDEN]) + vrow(V_PB1))
    logit = jnp.sum(e * vrow(V_PW2), axis=-1, keepdims=True) + vp_ref[V_PB2:V_PB2 + 1, 0:1]
    alpha = jnp.exp(logit) * mask                        # (N, 1)
    asum = 0.0
    for b in range(B):
        s_b = jnp.sum(alpha[b * S:(b + 1) * S, :], axis=0, keepdims=True)   # (1, 1)
        asum = asum + rowsel[:, b:b + 1] * s_b
    anorm = alpha * pl.reciprocal(asum + 1e-8, approx=True)
    o_ref[...] = _mm(bsel, x * anorm)                    # (B, H): one selection matmul


# ---------------- pallas_call wrapper ----------------------------------------------------
_VMEM_SPEC = pl.BlockSpec(memory_space=pltpu.MemorySpace.VMEM)


def performer_encoder_forward(input_embs, attention_mask, params):
    # NOTE: extended_attention_mask is computed in the PyTorch forward but never consumed by
    # the performer encoder in this code path; dropout is identity at inference.
    x = input_embs.reshape(N, HIDDEN).astype(jnp.float32)       # fold batch into sublanes
    mask = attention_mask.reshape(N, 1).astype(jnp.float32)
    return pl.pallas_call(
        fused_kernel,
        out_shape=jax.ShapeDtypeStruct((B, HIDDEN), jnp.float32),
        in_specs=[_VMEM_SPEC] * 5,
        out_specs=_VMEM_SPEC,
    )(x, mask, params["wmat"], params["vpar"], params["cmsk"])


# ---------------- parameter init (deterministic, matches the module's init_weights) ------
def orthogonal_random_matrix(key, nb_rows, nb_cols):
    # gaussian_orthogonal_random_matrix (performer default, scaling=0)
    nb_full = nb_rows // nb_cols
    ks = jax.random.split(key, nb_full + 2)
    blocks = []
    for i in range(nb_full):
        q, _ = jnp.linalg.qr(jax.random.normal(ks[i], (nb_cols, nb_cols), jnp.float32))
        blocks.append(q.T)
    rem = nb_rows - nb_full * nb_cols
    if rem:
        q, _ = jnp.linalg.qr(jax.random.normal(ks[nb_full], (nb_cols, nb_cols), jnp.float32))
        blocks.append(q.T[:rem])
    mat = jnp.concatenate(blocks, axis=0)
    mult = jnp.linalg.norm(jax.random.normal(ks[-1], (nb_rows, nb_cols), jnp.float32), axis=1)
    return mult[:, None] * mat                           # (nb_rows, nb_cols)


def _block_diag(tile, n_blocks):
    r, c = tile.shape
    out = jnp.zeros((r * n_blocks, c * n_blocks), jnp.float32)
    for h in range(n_blocks):
        out = out.at[h * r:(h + 1) * r, h * c:(h + 1) * c].set(tile)
    return out


def _pad_lanes(m, width=SLAB_LANES):
    return jnp.pad(m, ((0, 0), (0, width - m.shape[1])))


def init_params(key):
    keys = iter(jax.random.split(key, 8 * DEPTH + 8))

    def nrm(shape):
        return jax.random.normal(next(keys), shape, jnp.float32) * INIT_RANGE

    ones = lambda s: jnp.ones(s, jnp.float32)
    zeros = lambda s: jnp.zeros(s, jnp.float32)

    wmat_rows = []
    vpar_rows = [_pad_lanes(ones((1, HIDDEN))),          # eln_g
                 _pad_lanes(zeros((1, HIDDEN)))]         # eln_b

    for _ in range(DEPTH):
        proj = orthogonal_random_matrix(next(keys), NB_FEATURES, DIM_HEAD)   # (m, dh)
        wp = _pad_lanes(_block_diag(proj.T, HEADS))      # (H, PP): proj shared across heads
        wq, wk, wv = nrm((HIDDEN, HIDDEN)), nrm((HIDDEN, HIDDEN)), nrm((HIDDEN, HIDDEN))
        wqkv = _pad_lanes(jnp.concatenate([wq, wk, wv], axis=1))   # fused QKV (H, 3H)
        wo = _pad_lanes(nrm((HIDDEN, HIDDEN)))
        w1 = _pad_lanes(nrm((HIDDEN, FF_MULT * HIDDEN)))
        w2 = _pad_lanes(nrm((FF_MULT * HIDDEN, HIDDEN)))
        wmat_rows += [wqkv, wp, wo, w1, w2]
        vpar_rows += [_pad_lanes(ones((1, HIDDEN))),                 # aln_g
                      _pad_lanes(zeros((1, HIDDEN))),                # aln_b
                      _pad_lanes(zeros((1, 3 * HIDDEN))),            # bqkv
                      _pad_lanes(zeros((1, HIDDEN))),                # bo
                      _pad_lanes(ones((1, HIDDEN))),                 # fln_g
                      _pad_lanes(zeros((1, HIDDEN))),                # fln_b
                      _pad_lanes(zeros((1, FF_MULT * HIDDEN))),      # b1
                      _pad_lanes(zeros((1, HIDDEN)))]                # b2

    pos_table = nrm((MAX_POS, HIDDEN))                   # position embedding table
    pw1 = _pad_lanes(nrm((HIDDEN, HIDDEN)))              # pooler fc1 weight
    pw2 = nrm((1, HIDDEN))                               # nn.Linear(H, 1).weight
    wmat_rows.append(pw1)
    vpar_rows += [_pad_lanes(zeros((1, HIDDEN))),        # pb1
                  _pad_lanes(pw2),                       # pw2 (row vector, used elementwise)
                  _pad_lanes(zeros((1, 1))),             # pb2
                  _pad_lanes(jnp.tile(pos_table[:S], (B, 1)))]   # pre-tiled positions (N, H)

    wmat = jnp.concatenate(wmat_rows, axis=0).astype(MM_DTYPE)
    vpar = jnp.concatenate(vpar_rows, axis=0)
    assert wmat.shape == (W_ROWS, SLAB_LANES), wmat.shape
    assert vpar.shape == (V_ROWS, SLAB_LANES), vpar.shape

    # constant structure masks
    cmask = jnp.zeros((HEADS, PP), jnp.float32)
    vhead = jnp.zeros((HEADS, HIDDEN), jnp.float32)
    for h in range(HEADS):
        cmask = cmask.at[h, h * NB_FEATURES:(h + 1) * NB_FEATURES].set(1.0)
        vhead = vhead.at[h, h * DIM_HEAD:(h + 1) * DIM_HEAD].set(1.0)
    wsq = _pad_lanes(_block_diag(jnp.ones((DIM_HEAD, NB_FEATURES), jnp.float32), HEADS))
    bb = _block_diag(jnp.ones((S, S), jnp.float32), B)   # (N, N)
    bsel = jnp.zeros((B, N), jnp.float32)
    rowsel = jnp.zeros((N, B), jnp.float32)
    for b in range(B):
        bsel = bsel.at[b, b * S:(b + 1) * S].set(1.0)
        rowsel = rowsel.at[b * S:(b + 1) * S, b].set(1.0)

    cmsk = jnp.concatenate([_pad_lanes(cmask), wsq, _pad_lanes(vhead),
                            _pad_lanes(bb), _pad_lanes(bsel), _pad_lanes(rowsel)], axis=0)
    assert cmsk.shape == (C_ROWS, SLAB_LANES), cmsk.shape

    return dict(wmat=wmat, vpar=vpar, cmsk=cmsk)


if __name__ == "__main__":
    key = jax.random.PRNGKey(0)
    k_in, k_params = jax.random.split(key)

    input_embs = jax.random.normal(k_in, (B, S, HIDDEN), jnp.float32)
    lengths = jnp.array([S, S - 2])
    attention_mask = (jnp.arange(S)[None, :] < lengths[:, None]).astype(jnp.float32)  # (B, S)

    params = init_params(k_params)
    fwd = jax.jit(performer_encoder_forward)
    out = jax.block_until_ready(fwd(input_embs, attention_mask, params))

    assert out.shape == (B, HIDDEN), out.shape
    assert bool(jnp.all(jnp.isfinite(out)))
    print("KERNEL_OK")
</pallas_src>

<mosaic_0001>
module attributes {stable_mosaic.version = 11 : i64} {
  func.func @fused_kernel(%arg0: memref<16x32xf32, #tpu.memory_space<vmem>>, %arg1: memref<16x1xf32, #tpu.memory_space<vmem>>, %arg2: memref<544x128xbf16, #tpu.memory_space<vmem>>, %arg3: memref<37x128xf32, #tpu.memory_space<vmem>>, %arg4: memref<70x128xf32, #tpu.memory_space<vmem>>, %arg5: memref<2x32xf32, #tpu.memory_space<vmem>>) attributes {dimension_semantics = [], scalar_prefetch = 0 : i64, scratch_operands = 0 : i64, tpu.core_type = #tpu.core_type<tc>} {
    %c0 = arith.constant 0 : index
    %c0_0 = arith.constant 0 : index
    %0 = vector.load %arg4[%c0, %c0_0] : memref<70x128xf32, #tpu.memory_space<vmem>>, vector<2x128xf32>
    %c2 = arith.constant 2 : index
    %c0_1 = arith.constant 0 : index
    %1 = vector.load %arg4[%c2, %c0_1] : memref<70x128xf32, #tpu.memory_space<vmem>>, vector<32x128xf32>
    %c34 = arith.constant 34 : index
    %c0_2 = arith.constant 0 : index
    %2 = vector.load %arg4[%c34, %c0_2] : memref<70x128xf32, #tpu.memory_space<vmem>>, vector<2x32xf32>
    %c36 = arith.constant 36 : index
    %c0_3 = arith.constant 0 : index
    %3 = vector.load %arg4[%c36, %c0_3] : memref<70x128xf32, #tpu.memory_space<vmem>>, vector<16x16xf32>
    %c52 = arith.constant 52 : index
    %c0_4 = arith.constant 0 : index
    %4 = vector.load %arg4[%c52, %c0_4] : memref<70x128xf32, #tpu.memory_space<vmem>>, vector<2x16xf32>
    %c54 = arith.constant 54 : index
    %c0_5 = arith.constant 0 : index
    %5 = vector.load %arg4[%c54, %c0_5] : memref<70x128xf32, #tpu.memory_space<vmem>>, vector<16x2xf32>
    %c0_6 = arith.constant 0 : index
    %c0_7 = arith.constant 0 : index
    %6 = vector.load %arg1[%c0_6, %c0_7] : memref<16x1xf32, #tpu.memory_space<vmem>>, vector<16x1xf32>
    %c21 = arith.constant 21 : index
    %c0_8 = arith.constant 0 : index
    %7 = vector.load %arg3[%c21, %c0_8] : memref<37x128xf32, #tpu.memory_space<vmem>>, vector<16x32xf32>
    %c0_9 = arith.constant 0 : index
    %c0_10 = arith.constant 0 : index
    %8 = vector.load %arg0[%c0_9, %c0_10] : memref<16x32xf32, #tpu.memory_space<vmem>>, vector<16x32xf32>
    %9 = arith.addf %8, %7 : vector<16x32xf32>
    %c0_11 = arith.constant 0 : index
    %c0_12 = arith.constant 0 : index
    %10 = vector.load %arg3[%c0_11, %c0_12] : memref<37x128xf32, #tpu.memory_space<vmem>>, vector<1x32xf32>
    %c1 = arith.constant 1 : index
    %c0_13 = arith.constant 0 : index
    %11 = vector.load %arg3[%c1, %c0_13] : memref<37x128xf32, #tpu.memory_space<vmem>>, vector<1x32xf32>
    %cst = arith.constant dense<0.000000e+00> : vector<16xf32>
    %12 = vector.multi_reduction <add>, %9, %cst [1] : vector<16x32xf32> to vector<16xf32>
    %13 = vector.shape_cast %12 : vector<16xf32> to vector<16x1xf32>
    %cst_14 = arith.constant 3.200000e+01 : f32
    %14 = vector.broadcast %cst_14 : f32 to vector<16x1xf32>
    %15 = arith.divf %13, %14 : vector<16x1xf32>
    %16 = vector.broadcast %15 : vector<16x1xf32> to vector<16x32xf32>
    %17 = arith.subf %9, %16 : vector<16x32xf32>
    %18 = arith.mulf %17, %17 : vector<16x32xf32>
    %cst_15 = arith.constant dense<0.000000e+00> : vector<16xf32>
    %19 = vector.multi_reduction <add>, %18, %cst_15 [1] : vector<16x32xf32> to vector<16xf32>
    %20 = vector.shape_cast %19 : vector<16xf32> to vector<16x1xf32>
    %cst_16 = arith.constant 3.200000e+01 : f32
    %21 = vector.broadcast %cst_16 : f32 to vector<16x1xf32>
    %22 = arith.divf %20, %21 : vector<16x1xf32>
    %23 = vector.broadcast %15 : vector<16x1xf32> to vector<16x32xf32>
    %24 = arith.subf %9, %23 : vector<16x32xf32>
    %cst_17 = arith.constant 9.99999996E-13 : f32
    %25 = vector.broadcast %cst_17 : f32 to vector<16x1xf32>
    %26 = arith.addf %22, %25 : vector<16x1xf32>
    %27 = math.rsqrt %26 : vector<16x1xf32>
    %28 = vector.broadcast %27 : vector<16x1xf32> to vector<16x32xf32>
    %29 = arith.mulf %24, %28 : vector<16x32xf32>
    %30 = vector.broadcast %10 : vector<1x32xf32> to vector<16x32xf32>
    %31 = arith.mulf %29, %30 : vector<16x32xf32>
    %32 = vector.broadcast %11 : vector<1x32xf32> to vector<16x32xf32>
    %33 = arith.addf %31, %32 : vector<16x32xf32>
    %c2_18 = arith.constant 2 : index
    %c0_19 = arith.constant 0 : index
    %34 = vector.load %arg3[%c2_18, %c0_19] : memref<37x128xf32, #tpu.memory_space<vmem>>, vector<1x32xf32>
    %c3 = arith.constant 3 : index
    %c0_20 = arith.constant 0 : index
    %35 = vector.load %arg3[%c3, %c0_20] : memref<37x128xf32, #tpu.memory_space<vmem>>, vector<1x32xf32>
    %cst_21 = arith.constant dense<0.000000e+00> : vector<16xf32>
    %36 = vector.multi_reduction <add>, %33, %cst_21 [1] : vector<16x32xf32> to vector<16xf32>
    %37 = vector.shape_cast %36 : vector<16xf32> to vector<16x1xf32>
    %cst_22 = arith.constant 3.200000e+01 : f32
    %38 = vector.broadcast %cst_22 : f32 to vector<16x1xf32>
    %39 = arith.divf %37, %38 : vector<16x1xf32>
    %40 = vector.broadcast %39 : vector<16x1xf32> to vector<16x32xf32>
    %41 = arith.subf %33, %40 : vector<16x32xf32>
    %42 = arith.mulf %41, %41 : vector<16x32xf32>
    %cst_23 = arith.constant dense<0.000000e+00> : vector<16xf32>
    %43 = vector.multi_reduction <add>, %42, %cst_23 [1] : vector<16x32xf32> to vector<16xf32>
    %44 = vector.shape_cast %43 : vector<16xf32> to vector<16x1xf32>
    %cst_24 = arith.constant 3.200000e+01 : f32
    %45 = vector.broadcast %cst_24 : f32 to vector<16x1xf32>
    %46 = arith.divf %44, %45 : vector<16x1xf32>
    %47 = vector.broadcast %39 : vector<16x1xf32> to vector<16x32xf32>
    %48 = arith.subf %33, %47 : vector<16x32xf32>
    %cst_25 = arith.constant 9.99999974E-6 : f32
    %49 = vector.broadcast %cst_25 : f32 to vector<16x1xf32>
    %50 = arith.addf %46, %49 : vector<16x1xf32>
    %51 = math.rsqrt %50 : vector<16x1xf32>
    %52 = vector.broadcast %51 : vector<16x1xf32> to vector<16x32xf32>
    %53 = arith.mulf %48, %52 : vector<16x32xf32>
    %54 = vector.broadcast %34 : vector<1x32xf32> to vector<16x32xf32>
    %55 = arith.mulf %53, %54 : vector<16x32xf32>
    %56 = vector.broadcast %35 : vector<1x32xf32> to vector<16x32xf32>
    %57 = arith.addf %55, %56 : vector<16x32xf32>
    %c0_26 = arith.constant 0 : index
    %c0_27 = arith.constant 0 : index
    %58 = vector.load %arg2[%c0_26, %c0_27] : memref<544x128xbf16, #tpu.memory_space<vmem>>, vector<32x96xbf16>
    %59 = arith.truncf %57 : vector<16x32xf32> to vector<16x32xbf16>
    %cst_28 = arith.constant dense<0.000000e+00> : vector<16x96xf32>
    %60 = tpu.matmul %59, %58, %cst_28 {dimension_numbers = #tpu.dot_dimension_numbers<[1], [0], [0], [1], [0, 0, 1, 1], [], []>} : vector<16x32xbf16>, vector<32x96xbf16>, vector<16x96xf32> -> vector<16x96xf32>
    %c4 = arith.constant 4 : index
    %c0_29 = arith.constant 0 : index
    %61 = vector.load %arg3[%c4, %c0_29] : memref<37x128xf32, #tpu.memory_space<vmem>>, vector<1x96xf32>
    %62 = vector.broadcast %61 : vector<1x96xf32> to vector<16x96xf32>
    %63 = arith.addf %60, %62 : vector<16x96xf32>
    %64 = vector.extract_strided_slice %63 {offsets = [0, 0], sizes = [16, 32], strides = [1, 1]} : vector<16x96xf32> to vector<16x32xf32>
    %cst_30 = arith.constant 5.000000e-01 : f32
    %65 = vector.broadcast %cst_30 : f32 to vector<16x32xf32>
    %66 = arith.mulf %64, %65 : vector<16x32xf32>
    %67 = vector.extract_strided_slice %63 {offsets = [0, 32], sizes = [16, 32], strides = [1, 1]} : vector<16x96xf32> to vector<16x32xf32>
    %cst_31 = arith.constant 5.000000e-01 : f32
    %68 = vector.broadcast %cst_31 : f32 to vector<16x32xf32>
    %69 = arith.mulf %67, %68 : vector<16x32xf32>
    %70 = vector.extract_strided_slice %63 {offsets = [0, 64], sizes = [16, 32], strides = [1, 1]} : vector<16x96xf32> to vector<16x32xf32>
    %c32 = arith.constant 32 : index
    %c0_32 = arith.constant 0 : index
    %71 = vector.load %arg2[%c32, %c0_32] : memref<544x128xbf16, #tpu.memory_space<vmem>>, vector<32x128xbf16>
    %72 = arith.truncf %66 : vector<16x32xf32> to vector<16x32xbf16>
    %cst_33 = arith.constant dense<0.000000e+00> : vector<16x128xf32>
    %73 = tpu.matmul %72, %71, %cst_33 {dimension_numbers = #tpu.dot_dimension_numbers<[1], [0], [0], [1], [0, 0, 1, 1], [], []>} : vector<16x32xbf16>, vector<32x128xbf16>, vector<16x128xf32> -> vector<16x128xf32>
    %74 = arith.truncf %69 : vector<16x32xf32> to vector<16x32xbf16>
    %cst_34 = arith.constant dense<0.000000e+00> : vector<16x128xf32>
    %75 = tpu.matmul %74, %71, %cst_34 {dimension_numbers = #tpu.dot_dimension_numbers<[1], [0], [0], [1], [0, 0, 1, 1], [], []>} : vector<16x32xbf16>, vector<32x128xbf16>, vector<16x128xf32> -> vector<16x128xf32>
    %76 = arith.mulf %66, %66 : vector<16x32xf32>
    %77 = arith.truncf %76 : vector<16x32xf32> to vector<16x32xbf16>
    %78 = arith.truncf %1 : vector<32x128xf32> to vector<32x128xbf16>
    %cst_35 = arith.constant dense<0.000000e+00> : vector<16x128xf32>
    %79 = tpu.matmul %77, %78, %cst_35 {dimension_numbers = #tpu.dot_dimension_numbers<[1], [0], [0], [1], [0, 0, 1, 1], [], []>} : vector<16x32xbf16>, vector<32x128xbf16>, vector<16x128xf32> -> vector<16x128xf32>
    %cst_36 = arith.constant 5.000000e-01 : f32
    %80 = vector.broadcast %cst_36 : f32 to vector<16x128xf32>
    %81 = arith.mulf %80, %79 : vector<16x128xf32>
    %82 = arith.mulf %69, %69 : vector<16x32xf32>
    %83 = arith.truncf %82 : vector<16x32xf32> to vector<16x32xbf16>
    %84 = arith.truncf %1 : vector<32x128xf32> to vector<32x128xbf16>
    %cst_37 = arith.constant dense<0.000000e+00> : vector<16x128xf32>
    %85 = tpu.matmul %83, %84, %cst_37 {dimension_numbers = #tpu.dot_dimension_numbers<[1], [0], [0], [1], [0, 0, 1, 1], [], []>} : vector<16x32xbf16>, vector<32x128xbf16>, vector<16x128xf32> -> vector<16x128xf32>
    %cst_38 = arith.constant 5.000000e-01 : f32
    %86 = vector.broadcast %cst_38 : f32 to vector<16x128xf32>
    %87 = arith.mulf %86, %85 : vector<16x128xf32>
    %88 = vector.extract_strided_slice %0 {offsets = [0, 0], sizes = [1, 128], strides = [1, 1]} : vector<2x128xf32> to vector<1x128xf32>
    %cst_39 = arith.constant 5.000000e-01 : f32
    %89 = vector.broadcast %cst_39 : f32 to vector<1x128xf32>
    %90 = arith.cmpf ogt, %88, %89 : vector<1x128xf32>
    %cst_40 = arith.constant -1.000000e+30 : f32
    %91 = vector.shape_cast %90 : vector<1x128xi1> to vector<1x128xi1>
    %92 = vector.broadcast %91 : vector<1x128xi1> to vector<16x128xi1>
    %93 = vector.broadcast %cst_40 : f32 to vector<16x128xf32>
    %94 = arith.select %92, %73, %93 : vector<16x128xi1>, vector<16x128xf32>
    %cst_41 = arith.constant dense<0xFF800000> : vector<16xf32>
    %95 = vector.multi_reduction <maximumf>, %94, %cst_41 [1] : vector<16x128xf32> to vector<16xf32>
    %96 = vector.shape_cast %95 : vector<16xf32> to vector<16x1xf32>
    %97 = vector.broadcast %88 : vector<1x128xf32> to vector<16x128xf32>
    %98 = vector.broadcast %96 : vector<16x1xf32> to vector<16x128xf32>
    %99 = arith.mulf %97, %98 : vector<16x128xf32>
    %cst_42 = arith.constant 0.000000e+00 : f32
    %100 = vector.broadcast %cst_42 : f32 to vector<16x128xf32>
    %101 = arith.addf %100, %99 : vector<16x128xf32>
    %cst_43 = arith.constant 5.000000e-01 : f32
    %102 = vector.broadcast %cst_43 : f32 to vector<1x128xf32>
    %103 = arith.cmpf ogt, %88, %102 : vector<1x128xf32>
    %cst_44 = arith.constant -1.000000e+30 : f32
    %104 = vector.shape_cast %103 : vector<1x128xi1> to vector<1x128xi1>
    %105 = vector.broadcast %104 : vector<1x128xi1> to vector<16x128xi1>
    %106 = vector.broadcast %cst_44 : f32 to vector<16x128xf32>
    %107 = arith.select %105, %75, %106 : vector<16x128xi1>, vector<16x128xf32>
    %108 = vector.extract_strided_slice %107 {offsets = [0, 0], sizes = [8, 128], strides = [1, 1]} : vector<16x128xf32> to vector<8x128xf32>
    %cst_45 = arith.constant dense<0xFF800000> : vector<8xf32>
    %109 = vector.multi_reduction <maximumf>, %108, %cst_45 [1] : vector<8x128xf32> to vector<8xf32>
    %110 = vector.shape_cast %109 : vector<8xf32> to vector<8x1xf32>
    %cst_46 = arith.constant dense<0xFF800000> : vector<1xf32>
    %111 = vector.multi_reduction <maximumf>, %110, %cst_46 [0] : vector<8x1xf32> to vector<1xf32>
    %112 = vector.shape_cast %111 : vector<1xf32> to vector<1x1xf32>
    %113 = vector.extract_strided_slice %5 {offsets = [0, 0], sizes = [16, 1], strides = [1, 1]} : vector<16x2xf32> to vector<16x1xf32>
    %114 = vector.broadcast %112 : vector<1x1xf32> to vector<16x1xf32>
    %115 = arith.mulf %113, %114 : vector<16x1xf32>
    %cst_47 = arith.constant 0.000000e+00 : f32
    %116 = vector.broadcast %cst_47 : f32 to vector<16x1xf32>
    %117 = arith.addf %116, %115 : vector<16x1xf32>
    %118 = vector.extract_strided_slice %107 {offsets = [8, 0], sizes = [8, 128], strides = [1, 1]} : vector<16x128xf32> to vector<8x128xf32>
    %cst_48 = arith.constant dense<0xFF800000> : vector<8xf32>
    %119 = vector.multi_reduction <maximumf>, %118, %cst_48 [1] : vector<8x128xf32> to vector<8xf32>
    %120 = vector.shape_cast %119 : vector<8xf32> to vector<8x1xf32>
    %cst_49 = arith.constant dense<0xFF800000> : vector<1xf32>
    %121 = vector.multi_reduction <maximumf>, %120, %cst_49 [0] : vector<8x1xf32> to vector<1xf32>
    %122 = vector.shape_cast %121 : vector<1xf32> to vector<1x1xf32>
    %123 = vector.extract_strided_slice %5 {offsets = [0, 1], sizes = [16, 1], strides = [1, 1]} : vector<16x2xf32> to vector<16x1xf32>
    %124 = vector.broadcast %122 : vector<1x1xf32> to vector<16x1xf32>
    %125 = arith.mulf %123, %124 : vector<16x1xf32>
    %126 = arith.addf %117, %125 : vector<16x1xf32>
    %127 = vector.broadcast %88 : vector<1x128xf32> to vector<16x128xf32>
    %128 = vector.broadcast %126 : vector<16x1xf32> to vector<16x128xf32>
    %129 = arith.mulf %127, %128 : vector<16x128xf32>
    %cst_50 = arith.constant 0.000000e+00 : f32
    %130 = vector.broadcast %cst_50 : f32 to vector<16x128xf32>
    %131 = arith.addf %130, %129 : vector<16x128xf32>
    %132 = vector.extract_strided_slice %0 {offsets = [1, 0], sizes = [1, 128], strides = [1, 1]} : vector<2x128xf32> to vector<1x128xf32>
    %cst_51 = arith.constant 5.000000e-01 : f32
    %133 = vector.broadcast %cst_51 : f32 to vector<1x128xf32>
    %134 = arith.cmpf ogt, %132, %133 : vector<1x128xf32>
    %cst_52 = arith.constant -1.000000e+30 : f32
    %135 = vector.shape_cast %134 : vector<1x128xi1> to vector<1x128xi1>
    %136 = vector.broadcast %135 : vector<1x128xi1> to vector<16x128xi1>
    %137 = vector.broadcast %cst_52 : f32 to vector<16x128xf32>
    %138 = arith.select %136, %73, %137 : vector<16x128xi1>, vector<16x128xf32>
    %cst_53 = arith.constant dense<0xFF800000> : vector<16xf32>
    %139 = vector.multi_reduction <maximumf>, %138, %cst_53 [1] : vector<16x128xf32> to vector<16xf32>
    %140 = vector.shape_cast %139 : vector<16xf32> to vector<16x1xf32>
    %141 = vector.broadcast %132 : vector<1x128xf32> to vector<16x128xf32>
    %142 = vector.broadcast %140 : vector<16x1xf32> to vector<16x128xf32>
    %143 = arith.mulf %141, %142 : vector<16x128xf32>
    %144 = arith.addf %101, %143 : vector<16x128xf32>
    %cst_54 = arith.constant 5.000000e-01 : f32
    %145 = vector.broadcast %cst_54 : f32 to vector<1x128xf32>
    %146 = arith.cmpf ogt, %132, %145 : vector<1x128xf32>
    %cst_55 = arith.constant -1.000000e+30 : f32
    %147 = vector.shape_cast %146 : vector<1x128xi1> to vector<1x128xi1>
    %148 = vector.broadcast %147 : vector<1x128xi1> to vector<16x128xi1>
    %149 = vector.broadcast %cst_55 : f32 to vector<16x128xf32>
    %150 = arith.select %148, %75, %149 : vector<16x128xi1>, vector<16x128xf32>
    %151 = vector.extract_strided_slice %150 {offsets = [0, 0], sizes = [8, 128], strides = [1, 1]} : vector<16x128xf32> to vector<8x128xf32>
    %cst_56 = arith.constant dense<0xFF800000> : vector<8xf32>
    %152 = vector.multi_reduction <maximumf>, %151, %cst_56 [1] : vector<8x128xf32> to vector<8xf32>
    %153 = vector.shape_cast %152 : vector<8xf32> to vector<8x1xf32>
    %cst_57 = arith.constant dense<0xFF800000> : vector<1xf32>
    %154 = vector.multi_reduction <maximumf>, %153, %cst_57 [0] : vector<8x1xf32> to vector<1xf32>
    %155 = vector.shape_cast %154 : vector<1xf32> to vector<1x1xf32>
    %156 = vector.extract_strided_slice %5 {offsets = [0, 0], sizes = [16, 1], strides = [1, 1]} : vector<16x2xf32> to vector<16x1xf32>
    %157 = vector.broadcast %155 : vector<1x1xf32> to vector<16x1xf32>
    %158 = arith.mulf %156, %157 : vector<16x1xf32>
    %cst_58 = arith.constant 0.000000e+00 : f32
    %159 = vector.broadcast %cst_58 : f32 to vector<16x1xf32>
    %160 = arith.addf %159, %158 : vector<16x1xf32>
    %161 = vector.extract_strided_slice %150 {offsets = [8, 0], sizes = [8, 128], strides = [1, 1]} : vector<16x128xf32> to vector<8x128xf32>
    %cst_59 = arith.constant dense<0xFF800000> : vector<8xf32>
    %162 = vector.multi_reduction <maximumf>, %161, %cst_59 [1] : vector<8x128xf32> to vector<8xf32>
    %163 = vector.shape_cast %162 : vector<8xf32> to vector<8x1xf32>
    %cst_60 = arith.constant dense<0xFF800000> : vector<1xf32>
    %164 = vector.multi_reduction <maximumf>, %163, %cst_60 [0] : vector<8x1xf32> to vector<1xf32>
    %165 = vector.shape_cast %164 : vector<1xf32> to vector<1x1xf32>
    %166 = vector.extract_strided_slice %5 {offsets = [0, 1], sizes = [16, 1], strides = [1, 1]} : vector<16x2xf32> to vector<16x1xf32>
    %167 = vector.broadcast %165 : vector<1x1xf32> to vector<16x1xf32>
    %168 = arith.mulf %166, %167 : vector<16x1xf32>
    %169 = arith.addf %160, %168 : vector<16x1xf32>
    %170 = vector.broadcast %132 : vector<1x128xf32> to vector<16x128xf32>
    %171 = vector.broadcast %169 : vector<16x1xf32> to vector<16x128xf32>
    %172 = arith.mulf %170, %171 : vector<16x128xf32>
    %173 = arith.addf %131, %172 : vector<16x128xf32>
    %174 = arith.subf %73, %81 : vector<16x128xf32>
    %175 = arith.subf %174, %144 : vector<16x128xf32>
    %176 = math.exp %175 : vector<16x128xf32>
    %cst_61 = arith.constant 9.99999974E-5 : f32
    %177 = vector.broadcast %cst_61 : f32 to vector<16x128xf32>
    %178 = arith.addf %176, %177 : vector<16x128xf32>
    %cst_62 = arith.constant 0.150755674 : f32
    %179 = vector.broadcast %cst_62 : f32 to vector<16x128xf32>
    %180 = arith.mulf %179, %178 : vector<16x128xf32>
    %181 = arith.subf %75, %87 : vector<16x128xf32>
    %182 = arith.subf %181, %173 : vector<16x128xf32>
    %183 = math.exp %182 : vector<16x128xf32>
    %cst_63 = arith.constant 9.99999974E-5 : f32
    %184 = vector.broadcast %cst_63 : f32 to vector<16x128xf32>
    %185 = arith.addf %183, %184 : vector<16x128xf32>
    %cst_64 = arith.constant 0.150755674 : f32
    %186 = vector.broadcast %cst_64 : f32 to vector<16x128xf32>
    %187 = arith.mulf %186, %185 : vector<16x128xf32>
    %cst_65 = arith.constant 0.000000e+00 : f32
    %188 = vector.broadcast %cst_65 : f32 to vector<16x32xf32>
    %189 = vector.extract_strided_slice %0 {offsets = [0, 0], sizes = [1, 128], strides = [1, 1]} : vector<2x128xf32> to vector<1x128xf32>
    %190 = vector.broadcast %189 : vector<1x128xf32> to vector<16x128xf32>
    %191 = arith.mulf %180, %190 : vector<16x128xf32>
    %192 = arith.truncf %191 : vector<16x128xf32> to vector<16x128xbf16>
    %193 = arith.truncf %187 : vector<16x128xf32> to vector<16x128xbf16>
    %cst_66 = arith.constant dense<0.000000e+00> : vector<16x16xf32>
    %194 = tpu.matmul %192, %193, %cst_66 {dimension_numbers = #tpu.dot_dimension_numbers<[1], [1], [0], [0], [0, 0, 1, 0], [], []>} : vector<16x128xbf16>, vector<16x128xbf16>, vector<16x16xf32> -> vector<16x16xf32>
    %195 = arith.mulf %194, %3 : vector<16x16xf32>
    %cst_67 = arith.constant dense<0.000000e+00> : vector<16xf32>
    %196 = vector.multi_reduction <add>, %195, %cst_67 [1] : vector<16x16xf32> to vector<16xf32>
    %197 = vector.shape_cast %196 : vector<16xf32> to vector<16x1xf32>
    %198 = arith.truncf %195 : vector<16x16xf32> to vector<16x16xbf16>
    %199 = arith.truncf %70 : vector<16x32xf32> to vector<16x32xbf16>
    %cst_68 = arith.constant dense<0.000000e+00> : vector<16x32xf32>
    %200 = tpu.matmul %198, %199, %cst_68 {dimension_numbers = #tpu.dot_dimension_numbers<[1], [0], [0], [1], [0, 0, 1, 1], [], []>} : vector<16x16xbf16>, vector<16x32xbf16>, vector<16x32xf32> -> vector<16x32xf32>
    %201 = tpu.reciprocal %197 {approx = true} : vector<16x1xf32> -> vector<16x1xf32>
    %202 = vector.broadcast %201 : vector<16x1xf32> to vector<16x32xf32>
    %203 = arith.mulf %200, %202 : vector<16x32xf32>
    %204 = vector.extract_strided_slice %2 {offsets = [0, 0], sizes = [1, 32], strides = [1, 1]} : vector<2x32xf32> to vector<1x32xf32>
    %205 = vector.broadcast %204 : vector<1x32xf32> to vector<16x32xf32>
    %206 = arith.mulf %203, %205 : vector<16x32xf32>
    %207 = arith.addf %188, %206 : vector<16x32xf32>
    %208 = vector.extract_strided_slice %0 {offsets = [1, 0], sizes = [1, 128], strides = [1, 1]} : vector<2x128xf32> to vector<1x128xf32>
    %209 = vector.broadcast %208 : vector<1x128xf32> to vector<16x128xf32>
    %210 = arith.mulf %180, %209 : vector<16x128xf32>
    %211 = arith.truncf %210 : vector<16x128xf32> to vector<16x128xbf16>
    %212 = arith.truncf %187 : vector<16x128xf32> to vector<16x128xbf16>
    %cst_69 = arith.constant dense<0.000000e+00> : vector<16x16xf32>
    %213 = tpu.matmul %211, %212, %cst_69 {dimension_numbers = #tpu.dot_dimension_numbers<[1], [1], [0], [0], [0, 0, 1, 0], [], []>} : vector<16x128xbf16>, vector<16x128xbf16>, vector<16x16xf32> -> vector<16x16xf32>
    %214 = arith.mulf %213, %3 : vector<16x16xf32>
    %cst_70 = arith.constant dense<0.000000e+00> : vector<16xf32>
    %215 = vector.multi_reduction <add>, %214, %cst_70 [1] : vector<16x16xf32> to vector<16xf32>
    %216 = vector.shape_cast %215 : vector<16xf32> to vector<16x1xf32>
    %217 = arith.truncf %214 : vector<16x16xf32> to vector<16x16xbf16>
    %218 = arith.truncf %70 : vector<16x32xf32> to vector<16x32xbf16>
    %cst_71 = arith.constant dense<0.000000e+00> : vector<16x32xf32>
    %219 = tpu.matmul %217, %218, %cst_71 {dimension_numbers = #tpu.dot_dimension_numbers<[1], [0], [0], [1], [0, 0, 1, 1], [], []>} : vector<16x16xbf16>, vector<16x32xbf16>, vector<16x32xf32> -> vector<16x32xf32>
    %220 = tpu.reciprocal %216 {approx = true} : vector<16x1xf32> -> vector<16x1xf32>
    %221 = vector.broadcast %220 : vector<16x1xf32> to vector<16x32xf32>
    %222 = arith.mulf %219, %221 : vector<16x32xf32>
    %223 = vector.extract_strided_slice %2 {offsets = [1, 0], sizes = [1, 32], strides = [1, 1]} : vector<2x32xf32> to vector<1x32xf32>
    %224 = vector.broadcast %223 : vector<1x32xf32> to vector<16x32xf32>
    %225 = arith.mulf %222, %224 : vector<16x32xf32>
    %226 = arith.addf %207, %225 : vector<16x32xf32>
    %c64 = arith.constant 64 : index
    %c0_72 = arith.constant 0 : index
    %227 = vector.load %arg2[%c64, %c0_72] : memref<544x128xbf16, #tpu.memory_space<vmem>>, vector<32x32xbf16>
    %228 = arith.truncf %226 : vector<16x32xf32> to vector<16x32xbf16>
    %cst_73 = arith.constant dense<0.000000e+00> : vector<16x32xf32>
    %229 = tpu.matmul %228, %227, %cst_73 {dimension_numbers = #tpu.dot_dimension_numbers<[1], [0], [0], [1], [0, 0, 1, 1], [], []>} : vector<16x32xbf16>, vector<32x32xbf16>, vector<16x32xf32> -> vector<16x32xf32>
    %230 = arith.addf %33, %229 : vector<16x32xf32>
    %c5 = arith.constant 5 : index
    %c0_74 = arith.constant 0 : index
    %231 = vector.load %arg3[%c5, %c0_74] : memref<37x128xf32, #tpu.memory_space<vmem>>, vector<1x32xf32>
    %232 = vector.broadcast %231 : vector<1x32xf32> to vector<16x32xf32>
    %233 = arith.addf %230, %232 : vector<16x32xf32>
    %c6 = arith.constant 6 : index
    %c0_75 = arith.constant 0 : index
    %234 = vector.load %arg3[%c6, %c0_75] : memref<37x128xf32, #tpu.memory_space<vmem>>, vector<1x32xf32>
    %c7 = arith.constant 7 : index
    %c0_76 = arith.constant 0 : index
    %235 = vector.load %arg3[%c7, %c0_76] : memref<37x128xf32, #tpu.memory_space<vmem>>, vector<1x32xf32>
    %cst_77 = arith.constant dense<0.000000e+00> : vector<16xf32>
    %236 = vector.multi_reduction <add>, %233, %cst_77 [1] : vector<16x32xf32> to vector<16xf32>
    %237 = vector.shape_cast %236 : vector<16xf32> to vector<16x1xf32>
    %cst_78 = arith.constant 3.200000e+01 : f32
    %238 = vector.broadcast %cst_78 : f32 to vector<16x1xf32>
    %239 = arith.divf %237, %238 : vector<16x1xf32>
    %240 = vector.broadcast %239 : vector<16x1xf32> to vector<16x32xf32>
    %241 = arith.subf %233, %240 : vector<16x32xf32>
    %242 = arith.mulf %241, %241 : vector<16x32xf32>
    %cst_79 = arith.constant dense<0.000000e+00> : vector<16xf32>
    %243 = vector.multi_reduction <add>, %242, %cst_79 [1] : vector<16x32xf32> to vector<16xf32>
    %244 = vector.shape_cast %243 : vector<16xf32> to vector<16x1xf32>
    %cst_80 = arith.constant 3.200000e+01 : f32
    %245 = vector.broadcast %cst_80 : f32 to vector<16x1xf32>
    %246 = arith.divf %244, %245 : vector<16x1xf32>
    %247 = vector.broadcast %239 : vector<16x1xf32> to vector<16x32xf32>
    %248 = arith.subf %233, %247 : vector<16x32xf32>
    %cst_81 = arith.constant 9.99999974E-6 : f32
    %249 = vector.broadcast %cst_81 : f32 to vector<16x1xf32>
    %250 = arith.addf %246, %249 : vector<16x1xf32>
    %251 = math.rsqrt %250 : vector<16x1xf32>
    %252 = vector.broadcast %251 : vector<16x1xf32> to vector<16x32xf32>
    %253 = arith.mulf %248, %252 : vector<16x32xf32>
    %254 = vector.broadcast %234 : vector<1x32xf32> to vector<16x32xf32>
    %255 = arith.mulf %253, %254 : vector<16x32xf32>
    %256 = vector.broadcast %235 : vector<1x32xf32> to vector<16x32xf32>
    %257 = arith.addf %255, %256 : vector<16x32xf32>
    %c96 = arith.constant 96 : index
    %c0_82 = arith.constant 0 : index
    %258 = vector.load %arg2[%c96, %c0_82] : memref<544x128xbf16, #tpu.memory_space<vmem>>, vector<32x128xbf16>
    %259 = arith.truncf %257 : vector<16x32xf32> to vector<16x32xbf16>
    %cst_83 = arith.constant dense<0.000000e+00> : vector<16x128xf32>
    %260 = tpu.matmul %259, %258, %cst_83 {dimension_numbers = #tpu.dot_dimension_numbers<[1], [0], [0], [1], [0, 0, 1, 1], [], []>} : vector<16x32xbf16>, vector<32x128xbf16>, vector<16x128xf32> -> vector<16x128xf32>
    %c8 = arith.constant 8 : index
    %c0_84 = arith.constant 0 : index
    %261 = vector.load %arg3[%c8, %c0_84] : memref<37x128xf32, #tpu.memory_space<vmem>>, vector<1x128xf32>
    %262 = vector.broadcast %261 : vector<1x128xf32> to vector<16x128xf32>
    %263 = arith.addf %260, %262 : vector<16x128xf32>
    %264 = arith.mulf %263, %263 : vector<16x128xf32>
    %265 = arith.mulf %263, %264 : vector<16x128xf32>
    %cst_85 = arith.constant 4.471500e-02 : f32
    %266 = vector.broadcast %cst_85 : f32 to vector<16x128xf32>
    %267 = arith.mulf %266, %265 : vector<16x128xf32>
    %268 = arith.addf %263, %267 : vector<16x128xf32>
    %cst_86 = arith.constant 0.797884583 : f32
    %269 = vector.broadcast %cst_86 : f32 to vector<16x128xf32>
    %270 = arith.mulf %269, %268 : vector<16x128xf32>
    %271 = math.tanh %270 : vector<16x128xf32>
    %cst_87 = arith.constant 1.000000e+00 : f32
    %272 = vector.broadcast %cst_87 : f32 to vector<16x128xf32>
    %273 = arith.addf %272, %271 : vector<16x128xf32>
    %cst_88 = arith.constant 5.000000e-01 : f32
    %274 = vector.broadcast %cst_88 : f32 to vector<16x128xf32>
    %275 = arith.mulf %274, %273 : vector<16x128xf32>
    %276 = arith.mulf %263, %275 : vector<16x128xf32>
    %c128 = arith.constant 128 : index
    %c0_89 = arith.constant 0 : index
    %277 = vector.load %arg2[%c128, %c0_89] : memref<544x128xbf16, #tpu.memory_space<vmem>>, vector<128x32xbf16>
    %278 = arith.truncf %276 : vector<16x128xf32> to vector<16x128xbf16>
    %cst_90 = arith.constant dense<0.000000e+00> : vector<16x32xf32>
    %279 = tpu.matmul %278, %277, %cst_90 {dimension_numbers = #tpu.dot_dimension_numbers<[1], [0], [0], [1], [0, 0, 1, 1], [], []>} : vector<16x128xbf16>, vector<128x32xbf16>, vector<16x32xf32> -> vector<16x32xf32>
    %280 = arith.addf %233, %279 : vector<16x32xf32>
    %c9 = arith.constant 9 : index
    %c0_91 = arith.constant 0 : index
    %281 = vector.load %arg3[%c9, %c0_91] : memref<37x128xf32, #tpu.memory_space<vmem>>, vector<1x32xf32>
    %282 = vector.broadcast %281 : vector<1x32xf32> to vector<16x32xf32>
    %283 = arith.addf %280, %282 : vector<16x32xf32>
    %c10 = arith.constant 10 : index
    %c0_92 = arith.constant 0 : index
    %284 = vector.load %arg3[%c10, %c0_92] : memref<37x128xf32, #tpu.memory_space<vmem>>, vector<1x32xf32>
    %c11 = arith.constant 11 : index
    %c0_93 = arith.constant 0 : index
    %285 = vector.load %arg3[%c11, %c0_93] : memref<37x128xf32, #tpu.memory_space<vmem>>, vector<1x32xf32>
    %cst_94 = arith.constant dense<0.000000e+00> : vector<16xf32>
    %286 = vector.multi_reduction <add>, %283, %cst_94 [1] : vector<16x32xf32> to vector<16xf32>
    %287 = vector.shape_cast %286 : vector<16xf32> to vector<16x1xf32>
    %cst_95 = arith.constant 3.200000e+01 : f32
    %288 = vector.broadcast %cst_95 : f32 to vector<16x1xf32>
    %289 = arith.divf %287, %288 : vector<16x1xf32>
    %290 = vector.broadcast %289 : vector<16x1xf32> to vector<16x32xf32>
    %291 = arith.subf %283, %290 : vector<16x32xf32>
    %292 = arith.mulf %291, %291 : vector<16x32xf32>
    %cst_96 = arith.constant dense<0.000000e+00> : vector<16xf32>
    %293 = vector.multi_reduction <add>, %292, %cst_96 [1] : vector<16x32xf32> to vector<16xf32>
    %294 = vector.shape_cast %293 : vector<16xf32> to vector<16x1xf32>
    %cst_97 = arith.constant 3.200000e+01 : f32
    %295 = vector.broadcast %cst_97 : f32 to vector<16x1xf32>
    %296 = arith.divf %294, %295 : vector<16x1xf32>
    %297 = vector.broadcast %289 : vector<16x1xf32> to vector<16x32xf32>
    %298 = arith.subf %283, %297 : vector<16x32xf32>
    %cst_98 = arith.constant 9.99999974E-6 : f32
    %299 = vector.broadcast %cst_98 : f32 to vector<16x1xf32>
    %300 = arith.addf %296, %299 : vector<16x1xf32>
    %301 = math.rsqrt %300 : vector<16x1xf32>
    %302 = vector.broadcast %301 : vector<16x1xf32> to vector<16x32xf32>
    %303 = arith.mulf %298, %302 : vector<16x32xf32>
    %304 = vector.broadcast %284 : vector<1x32xf32> to vector<16x32xf32>
    %305 = arith.mulf %303, %304 : vector<16x32xf32>
    %306 = vector.broadcast %285 : vector<1x32xf32> to vector<16x32xf32>
    %307 = arith.addf %305, %306 : vector<16x32xf32>
    %c256 = arith.constant 256 : index
    %c0_99 = arith.constant 0 : index
    %308 = vector.load %arg2[%c256, %c0_99] : memref<544x128xbf16, #tpu.memory_space<vmem>>, vector<32x96xbf16>
    %309 = arith.truncf %307 : vector<16x32xf32> to vector<16x32xbf16>
    %cst_100 = arith.constant dense<0.000000e+00> : vector<16x96xf32>
    %310 = tpu.matmul %309, %308, %cst_100 {dimension_numbers = #tpu.dot_dimension_numbers<[1], [0], [0], [1], [0, 0, 1, 1], [], []>} : vector<16x32xbf16>, vector<32x96xbf16>, vector<16x96xf32> -> vector<16x96xf32>
    %c12 = arith.constant 12 : index
    %c0_101 = arith.constant 0 : index
    %311 = vector.load %arg3[%c12, %c0_101] : memref<37x128xf32, #tpu.memory_space<vmem>>, vector<1x96xf32>
    %312 = vector.broadcast %311 : vector<1x96xf32> to vector<16x96xf32>
    %313 = arith.addf %310, %312 : vector<16x96xf32>
    %314 = vector.extract_strided_slice %313 {offsets = [0, 0], sizes = [16, 32], strides = [1, 1]} : vector<16x96xf32> to vector<16x32xf32>
    %cst_102 = arith.constant 5.000000e-01 : f32
    %315 = vector.broadcast %cst_102 : f32 to vector<16x32xf32>
    %316 = arith.mulf %314, %315 : vector<16x32xf32>
    %317 = vector.extract_strided_slice %313 {offsets = [0, 32], sizes = [16, 32], strides = [1, 1]} : vector<16x96xf32> to vector<16x32xf32>
    %cst_103 = arith.constant 5.000000e-01 : f32
    %318 = vector.broadcast %cst_103 : f32 to vector<16x32xf32>
    %319 = arith.mulf %317, %318 : vector<16x32xf32>
    %320 = vector.extract_strided_slice %313 {offsets = [0, 64], sizes = [16, 32], strides = [1, 1]} : vector<16x96xf32> to vector<16x32xf32>
    %c288 = arith.constant 288 : index
    %c0_104 = arith.constant 0 : index
    %321 = vector.load %arg2[%c288, %c0_104] : memref<544x128xbf16, #tpu.memory_space<vmem>>, vector<32x128xbf16>
    %322 = arith.truncf %316 : vector<16x32xf32> to vector<16x32xbf16>
    %cst_105 = arith.constant dense<0.000000e+00> : vector<16x128xf32>
    %323 = tpu.matmul %322, %321, %cst_105 {dimension_numbers = #tpu.dot_dimension_numbers<[1], [0], [0], [1], [0, 0, 1, 1], [], []>} : vector<16x32xbf16>, vector<32x128xbf16>, vector<16x128xf32> -> vector<16x128xf32>
    %324 = arith.truncf %319 : vector<16x32xf32> to vector<16x32xbf16>
    %cst_106 = arith.constant dense<0.000000e+00> : vector<16x128xf32>
    %325 = tpu.matmul %324, %321, %cst_106 {dimension_numbers = #tpu.dot_dimension_numbers<[1], [0], [0], [1], [0, 0, 1, 1], [], []>} : vector<16x32xbf16>, vector<32x128xbf16>, vector<16x128xf32> -> vector<16x128xf32>
    %326 = arith.mulf %316, %316 : vector<16x32xf32>
    %327 = arith.truncf %326 : vector<16x32xf32> to vector<16x32xbf16>
    %328 = arith.truncf %1 : vector<32x128xf32> to vector<32x128xbf16>
    %cst_107 = arith.constant dense<0.000000e+00> : vector<16x128xf32>
    %329 = tpu.matmul %327, %328, %cst_107 {dimension_numbers = #tpu.dot_dimension_numbers<[1], [0], [0], [1], [0, 0, 1, 1], [], []>} : vector<16x32xbf16>, vector<32x128xbf16>, vector<16x128xf32> -> vector<16x128xf32>
    %cst_108 = arith.constant 5.000000e-01 : f32
    %330 = vector.broadcast %cst_108 : f32 to vector<16x128xf32>
    %331 = arith.mulf %330, %329 : vector<16x128xf32>
    %332 = arith.mulf %319, %319 : vector<16x32xf32>
    %333 = arith.truncf %332 : vector<16x32xf32> to vector<16x32xbf16>
    %334 = arith.truncf %1 : vector<32x128xf32> to vector<32x128xbf16>
    %cst_109 = arith.constant dense<0.000000e+00> : vector<16x128xf32>
    %335 = tpu.matmul %333, %334, %cst_109 {dimension_numbers = #tpu.dot_dimension_numbers<[1], [0], [0], [1], [0, 0, 1, 1], [], []>} : vector<16x32xbf16>, vector<32x128xbf16>, vector<16x128xf32> -> vector<16x128xf32>
    %cst_110 = arith.constant 5.000000e-01 : f32
    %336 = vector.broadcast %cst_110 : f32 to vector<16x128xf32>
    %337 = arith.mulf %336, %335 : vector<16x128xf32>
    %338 = vector.extract_strided_slice %0 {offsets = [0, 0], sizes = [1, 128], strides = [1, 1]} : vector<2x128xf32> to vector<1x128xf32>
    %cst_111 = arith.constant 5.000000e-01 : f32
    %339 = vector.broadcast %cst_111 : f32 to vector<1x128xf32>
    %340 = arith.cmpf ogt, %338, %339 : vector<1x128xf32>
    %cst_112 = arith.constant -1.000000e+30 : f32
    %341 = vector.shape_cast %340 : vector<1x128xi1> to vector<1x128xi1>
    %342 = vector.broadcast %341 : vector<1x128xi1> to vector<16x128xi1>
    %343 = vector.broadcast %cst_112 : f32 to vector<16x128xf32>
    %344 = arith.select %342, %323, %343 : vector<16x128xi1>, vector<16x128xf32>
    %cst_113 = arith.constant dense<0xFF800000> : vector<16xf32>
    %345 = vector.multi_reduction <maximumf>, %344, %cst_113 [1] : vector<16x128xf32> to vector<16xf32>
    %346 = vector.shape_cast %345 : vector<16xf32> to vector<16x1xf32>
    %347 = vector.broadcast %338 : vector<1x128xf32> to vector<16x128xf32>
    %348 = vector.broadcast %346 : vector<16x1xf32> to vector<16x128xf32>
    %349 = arith.mulf %347, %348 : vector<16x128xf32>
    %cst_114 = arith.constant 0.000000e+00 : f32
    %350 = vector.broadcast %cst_114 : f32 to vector<16x128xf32>
    %351 = arith.addf %350, %349 : vector<16x128xf32>
    %cst_115 = arith.constant 5.000000e-01 : f32
    %352 = vector.broadcast %cst_115 : f32 to vector<1x128xf32>
    %353 = arith.cmpf ogt, %338, %352 : vector<1x128xf32>
    %cst_116 = arith.constant -1.000000e+30 : f32
    %354 = vector.shape_cast %353 : vector<1x128xi1> to vector<1x128xi1>
    %355 = vector.broadcast %354 : vector<1x128xi1> to vector<16x128xi1>
    %356 = vector.broadcast %cst_116 : f32 to vector<16x128xf32>
    %357 = arith.select %355, %325, %356 : vector<16x128xi1>, vector<16x128xf32>
    %358 = vector.extract_strided_slice %357 {offsets = [0, 0], sizes = [8, 128], strides = [1, 1]} : vector<16x128xf32> to vector<8x128xf32>
    %cst_117 = arith.constant dense<0xFF800000> : vector<8xf32>
    %359 = vector.multi_reduction <maximumf>, %358, %cst_117 [1] : vector<8x128xf32> to vector<8xf32>
    %360 = vector.shape_cast %359 : vector<8xf32> to vector<8x1xf32>
    %cst_118 = arith.constant dense<0xFF800000> : vector<1xf32>
    %361 = vector.multi_reduction <maximumf>, %360, %cst_118 [0] : vector<8x1xf32> to vector<1xf32>
    %362 = vector.shape_cast %361 : vector<1xf32> to vector<1x1xf32>
    %363 = vector.extract_strided_slice %5 {offsets = [0, 0], sizes = [16, 1], strides = [1, 1]} : vector<16x2xf32> to vector<16x1xf32>
    %364 = vector.broadcast %362 : vector<1x1xf32> to vector<16x1xf32>
    %365 = arith.mulf %363, %364 : vector<16x1xf32>
    %cst_119 = arith.constant 0.000000e+00 : f32
    %366 = vector.broadcast %cst_119 : f32 to vector<16x1xf32>
    %367 = arith.addf %366, %365 : vector<16x1xf32>
    %368 = vector.extract_strided_slice %357 {offsets = [8, 0], sizes = [8, 128], strides = [1, 1]} : vector<16x128xf32> to vector<8x128xf32>
    %cst_120 = arith.constant dense<0xFF800000> : vector<8xf32>
    %369 = vector.multi_reduction <maximumf>, %368, %cst_120 [1] : vector<8x128xf32> to vector<8xf32>
    %370 = vector.shape_cast %369 : vector<8xf32> to vector<8x1xf32>
    %cst_121 = arith.constant dense<0xFF800000> : vector<1xf32>
    %371 = vector.multi_reduction <maximumf>, %370, %cst_121 [0] : vector<8x1xf32> to vector<1xf32>
    %372 = vector.shape_cast %371 : vector<1xf32> to vector<1x1xf32>
    %373 = vector.extract_strided_slice %5 {offsets = [0, 1], sizes = [16, 1], strides = [1, 1]} : vector<16x2xf32> to vector<16x1xf32>
    %374 = vector.broadcast %372 : vector<1x1xf32> to vector<16x1xf32>
    %375 = arith.mulf %373, %374 : vector<16x1xf32>
    %376 = arith.addf %367, %375 : vector<16x1xf32>
    %377 = vector.broadcast %338 : vector<1x128xf32> to vector<16x128xf32>
    %378 = vector.broadcast %376 : vector<16x1xf32> to vector<16x128xf32>
    %379 = arith.mulf %377, %378 : vector<16x128xf32>
    %cst_122 = arith.constant 0.000000e+00 : f32
    %380 = vector.broadcast %cst_122 : f32 to vector<16x128xf32>
    %381 = arith.addf %380, %379 : vector<16x128xf32>
    %382 = vector.extract_strided_slice %0 {offsets = [1, 0], sizes = [1, 128], strides = [1, 1]} : vector<2x128xf32> to vector<1x128xf32>
    %cst_123 = arith.constant 5.000000e-01 : f32
    %383 = vector.broadcast %cst_123 : f32 to vector<1x128xf32>
    %384 = arith.cmpf ogt, %382, %383 : vector<1x128xf32>
    %cst_124 = arith.constant -1.000000e+30 : f32
    %385 = vector.shape_cast %384 : vector<1x128xi1> to vector<1x128xi1>
    %386 = vector.broadcast %385 : vector<1x128xi1> to vector<16x128xi1>
    %387 = vector.broadcast %cst_124 : f32 to vector<16x128xf32>
    %388 = arith.select %386, %323, %387 : vector<16x128xi1>, vector<16x128xf32>
    %cst_125 = arith.constant dense<0xFF800000> : vector<16xf32>
    %389 = vector.multi_reduction <maximumf>, %388, %cst_125 [1] : vector<16x128xf32> to vector<16xf32>
    %390 = vector.shape_cast %389 : vector<16xf32> to vector<16x1xf32>
    %391 = vector.broadcast %382 : vector<1x128xf32> to vector<16x128xf32>
    %392 = vector.broadcast %390 : vector<16x1xf32> to vector<16x128xf32>
    %393 = arith.mulf %391, %392 : vector<16x128xf32>
    %394 = arith.addf %351, %393 : vector<16x128xf32>
    %cst_126 = arith.constant 5.000000e-01 : f32
    %395 = vector.broadcast %cst_126 : f32 to vector<1x128xf32>
    %396 = arith.cmpf ogt, %382, %395 : vector<1x128xf32>
    %cst_127 = arith.constant -1.000000e+30 : f32
    %397 = vector.shape_cast %396 : vector<1x128xi1> to vector<1x128xi1>
    %398 = vector.broadcast %397 : vector<1x128xi1> to vector<16x128xi1>
    %399 = vector.broadcast %cst_127 : f32 to vector<16x128xf32>
    %400 = arith.select %398, %325, %399 : vector<16x128xi1>, vector<16x128xf32>
    %401 = vector.extract_strided_slice %400 {offsets = [0, 0], sizes = [8, 128], strides = [1, 1]} : vector<16x128xf32> to vector<8x128xf32>
    %cst_128 = arith.constant dense<0xFF800000> : vector<8xf32>
    %402 = vector.multi_reduction <maximumf>, %401, %cst_128 [1] : vector<8x128xf32> to vector<8xf32>
    %403 = vector.shape_cast %402 : vector<8xf32> to vector<8x1xf32>
    %cst_129 = arith.constant dense<0xFF800000> : vector<1xf32>
    %404 = vector.multi_reduction <maximumf>, %403, %cst_129 [0] : vector<8x1xf32> to vector<1xf32>
    %405 = vector.shape_cast %404 : vector<1xf32> to vector<1x1xf32>
    %406 = vector.extract_strided_slice %5 {offsets = [0, 0], sizes = [16, 1], strides = [1, 1]} : vector<16x2xf32> to vector<16x1xf32>
    %407 = vector.broadcast %405 : vector<1x1xf32> to vector<16x1xf32>
    %408 = arith.mulf %406, %407 : vector<16x1xf32>
    %cst_130 = arith.constant 0.000000e+00 : f32
    %409 = vector.broadcast %cst_130 : f32 to vector<16x1xf32>
    %410 = arith.addf %409, %408 : vector<16x1xf32>
    %411 = vector.extract_strided_slice %400 {offsets = [8, 0], sizes = [8, 128], strides = [1, 1]} : vector<16x128xf32> to vector<8x128xf32>
    %cst_131 = arith.constant dense<0xFF800000> : vector<8xf32>
    %412 = vector.multi_reduction <maximumf>, %411, %cst_131 [1] : vector<8x128xf32> to vector<8xf32>
    %413 = vector.shape_cast %412 : vector<8xf32> to vector<8x1xf32>
    %cst_132 = arith.constant dense<0xFF800000> : vector<1xf32>
    %414 = vector.multi_reduction <maximumf>, %413, %cst_132 [0] : vector<8x1xf32> to vector<1xf32>
    %415 = vector.shape_cast %414 : vector<1xf32> to vector<1x1xf32>
    %416 = vector.extract_strided_slice %5 {offsets = [0, 1], sizes = [16, 1], strides = [1, 1]} : vector<16x2xf32> to vector<16x1xf32>
    %417 = vector.broadcast %415 : vector<1x1xf32> to vector<16x1xf32>
    %418 = arith.mulf %416, %417 : vector<16x1xf32>
    %419 = arith.addf %410, %418 : vector<16x1xf32>
    %420 = vector.broadcast %382 : vector<1x128xf32> to vector<16x128xf32>
    %421 = vector.broadcast %419 : vector<16x1xf32> to vector<16x128xf32>
    %422 = arith.mulf %420, %421 : vector<16x128xf32>
    %423 = arith.addf %381, %422 : vector<16x128xf32>
    %424 = arith.subf %323, %331 : vector<16x128xf32>
    %425 = arith.subf %424, %394 : vector<16x128xf32>
    %426 = math.exp %425 : vector<16x128xf32>
    %cst_133 = arith.constant 9.99999974E-5 : f32
    %427 = vector.broadcast %cst_133 : f32 to vector<16x128xf32>
    %428 = arith.addf %426, %427 : vector<16x128xf32>
    %cst_134 = arith.constant 0.150755674 : f32
    %429 = vector.broadcast %cst_134 : f32 to vector<16x128xf32>
    %430 = arith.mulf %429, %428 : vector<16x128xf32>
    %431 = arith.subf %325, %337 : vector<16x128xf32>
    %432 = arith.subf %431, %423 : vector<16x128xf32>
    %433 = math.exp %432 : vector<16x128xf32>
    %cst_135 = arith.constant 9.99999974E-5 : f32
    %434 = vector.broadcast %cst_135 : f32 to vector<16x128xf32>
    %435 = arith.addf %433, %434 : vector<16x128xf32>
    %cst_136 = arith.constant 0.150755674 : f32
    %436 = vector.broadcast %cst_136 : f32 to vector<16x128xf32>
    %437 = arith.mulf %436, %435 : vector<16x128xf32>
    %cst_137 = arith.constant 0.000000e+00 : f32
    %438 = vector.broadcast %cst_137 : f32 to vector<16x32xf32>
    %439 = vector.extract_strided_slice %0 {offsets = [0, 0], sizes = [1, 128], strides = [1, 1]} : vector<2x128xf32> to vector<1x128xf32>
    %440 = vector.broadcast %439 : vector<1x128xf32> to vector<16x128xf32>
    %441 = arith.mulf %430, %440 : vector<16x128xf32>
    %442 = arith.truncf %441 : vector<16x128xf32> to vector<16x128xbf16>
    %443 = arith.truncf %437 : vector<16x128xf32> to vector<16x128xbf16>
    %cst_138 = arith.constant dense<0.000000e+00> : vector<16x16xf32>
    %444 = tpu.matmul %442, %443, %cst_138 {dimension_numbers = #tpu.dot_dimension_numbers<[1], [1], [0], [0], [0, 0, 1, 0], [], []>} : vector<16x128xbf16>, vector<16x128xbf16>, vector<16x16xf32> -> vector<16x16xf32>
    %445 = arith.mulf %444, %3 : vector<16x16xf32>
    %cst_139 = arith.constant dense<0.000000e+00> : vector<16xf32>
    %446 = vector.multi_reduction <add>, %445, %cst_139 [1] : vector<16x16xf32> to vector<16xf32>
    %447 = vector.shape_cast %446 : vector<16xf32> to vector<16x1xf32>
    %448 = arith.truncf %445 : vector<16x16xf32> to vector<16x16xbf16>
    %449 = arith.truncf %320 : vector<16x32xf32> to vector<16x32xbf16>
    %cst_140 = arith.constant dense<0.000000e+00> : vector<16x32xf32>
    %450 = tpu.matmul %448, %449, %cst_140 {dimension_numbers = #tpu.dot_dimension_numbers<[1], [0], [0], [1], [0, 0, 1, 1], [], []>} : vector<16x16xbf16>, vector<16x32xbf16>, vector<16x32xf32> -> vector<16x32xf32>
    %451 = tpu.reciprocal %447 {approx = true} : vector<16x1xf32> -> vector<16x1xf32>
    %452 = vector.broadcast %451 : vector<16x1xf32> to vector<16x32xf32>
    %453 = arith.mulf %450, %452 : vector<16x32xf32>
    %454 = vector.extract_strided_slice %2 {offsets = [0, 0], sizes = [1, 32], strides = [1, 1]} : vector<2x32xf32> to vector<1x32xf32>
    %455 = vector.broadcast %454 : vector<1x32xf32> to vector<16x32xf32>
    %456 = arith.mulf %453, %455 : vector<16x32xf32>
    %457 = arith.addf %438, %456 : vector<16x32xf32>
    %458 = vector.extract_strided_slice %0 {offsets = [1, 0], sizes = [1, 128], strides = [1, 1]} : vector<2x128xf32> to vector<1x128xf32>
    %459 = vector.broadcast %458 : vector<1x128xf32> to vector<16x128xf32>
    %460 = arith.mulf %430, %459 : vector<16x128xf32>
    %461 = arith.truncf %460 : vector<16x128xf32> to vector<16x128xbf16>
    %462 = arith.truncf %437 : vector<16x128xf32> to vector<16x128xbf16>
    %cst_141 = arith.constant dense<0.000000e+00> : vector<16x16xf32>
    %463 = tpu.matmul %461, %462, %cst_141 {dimension_numbers = #tpu.dot_dimension_numbers<[1], [1], [0], [0], [0, 0, 1, 0], [], []>} : vector<16x128xbf16>, vector<16x128xbf16>, vector<16x16xf32> -> vector<16x16xf32>
    %464 = arith.mulf %463, %3 : vector<16x16xf32>
    %cst_142 = arith.constant dense<0.000000e+00> : vector<16xf32>
    %465 = vector.multi_reduction <add>, %464, %cst_142 [1] : vector<16x16xf32> to vector<16xf32>
    %466 = vector.shape_cast %465 : vector<16xf32> to vector<16x1xf32>
    %467 = arith.truncf %464 : vector<16x16xf32> to vector<16x16xbf16>
    %468 = arith.truncf %320 : vector<16x32xf32> to vector<16x32xbf16>
    %cst_143 = arith.constant dense<0.000000e+00> : vector<16x32xf32>
    %469 = tpu.matmul %467, %468, %cst_143 {dimension_numbers = #tpu.dot_dimension_numbers<[1], [0], [0], [1], [0, 0, 1, 1], [], []>} : vector<16x16xbf16>, vector<16x32xbf16>, vector<16x32xf32> -> vector<16x32xf32>
    %470 = tpu.reciprocal %466 {approx = true} : vector<16x1xf32> -> vector<16x1xf32>
    %471 = vector.broadcast %470 : vector<16x1xf32> to vector<16x32xf32>
    %472 = arith.mulf %469, %471 : vector<16x32xf32>
    %473 = vector.extract_strided_slice %2 {offsets = [1, 0], sizes = [1, 32], strides = [1, 1]} : vector<2x32xf32> to vector<1x32xf32>
    %474 = vector.broadcast %473 : vector<1x32xf32> to vector<16x32xf32>
    %475 = arith.mulf %472, %474 : vector<16x32xf32>
    %476 = arith.addf %457, %475 : vector<16x32xf32>
    %c320 = arith.constant 320 : index
    %c0_144 = arith.constant 0 : index
    %477 = vector.load %arg2[%c320, %c0_144] : memref<544x128xbf16, #tpu.memory_space<vmem>>, vector<32x32xbf16>
    %478 = arith.truncf %476 : vector<16x32xf32> to vector<16x32xbf16>
    %cst_145 = arith.constant dense<0.000000e+00> : vector<16x32xf32>
    %479 = tpu.matmul %478, %477, %cst_145 {dimension_numbers = #tpu.dot_dimension_numbers<[1], [0], [0], [1], [0, 0, 1, 1], [], []>} : vector<16x32xbf16>, vector<32x32xbf16>, vector<16x32xf32> -> vector<16x32xf32>
    %480 = arith.addf %283, %479 : vector<16x32xf32>
    %c13 = arith.constant 13 : index
    %c0_146 = arith.constant 0 : index
    %481 = vector.load %arg3[%c13, %c0_146] : memref<37x128xf32, #tpu.memory_space<vmem>>, vector<1x32xf32>
    %482 = vector.broadcast %481 : vector<1x32xf32> to vector<16x32xf32>
    %483 = arith.addf %480, %482 : vector<16x32xf32>
    %c14 = arith.constant 14 : index
    %c0_147 = arith.constant 0 : index
    %484 = vector.load %arg3[%c14, %c0_147] : memref<37x128xf32, #tpu.memory_space<vmem>>, vector<1x32xf32>
    %c15 = arith.constant 15 : index
    %c0_148 = arith.constant 0 : index
    %485 = vector.load %arg3[%c15, %c0_148] : memref<37x128xf32, #tpu.memory_space<vmem>>, vector<1x32xf32>
    %cst_149 = arith.constant dense<0.000000e+00> : vector<16xf32>
    %486 = vector.multi_reduction <add>, %483, %cst_149 [1] : vector<16x32xf32> to vector<16xf32>
    %487 = vector.shape_cast %486 : vector<16xf32> to vector<16x1xf32>
    %cst_150 = arith.constant 3.200000e+01 : f32
    %488 = vector.broadcast %cst_150 : f32 to vector<16x1xf32>
    %489 = arith.divf %487, %488 : vector<16x1xf32>
    %490 = vector.broadcast %489 : vector<16x1xf32> to vector<16x32xf32>
    %491 = arith.subf %483, %490 : vector<16x32xf32>
    %492 = arith.mulf %491, %491 : vector<16x32xf32>
    %cst_151 = arith.constant dense<0.000000e+00> : vector<16xf32>
    %493 = vector.multi_reduction <add>, %492, %cst_151 [1] : vector<16x32xf32> to vector<16xf32>
    %494 = vector.shape_cast %493 : vector<16xf32> to vector<16x1xf32>
    %cst_152 = arith.constant 3.200000e+01 : f32
    %495 = vector.broadcast %cst_152 : f32 to vector<16x1xf32>
    %496 = arith.divf %494, %495 : vector<16x1xf32>
    %497 = vector.broadcast %489 : vector<16x1xf32> to vector<16x32xf32>
    %498 = arith.subf %483, %497 : vector<16x32xf32>
    %cst_153 = arith.constant 9.99999974E-6 : f32
    %499 = vector.broadcast %cst_153 : f32 to vector<16x1xf32>
    %500 = arith.addf %496, %499 : vector<16x1xf32>
    %501 = math.rsqrt %500 : vector<16x1xf32>
    %502 = vector.broadcast %501 : vector<16x1xf32> to vector<16x32xf32>
    %503 = arith.mulf %498, %502 : vector<16x32xf32>
    %504 = vector.broadcast %484 : vector<1x32xf32> to vector<16x32xf32>
    %505 = arith.mulf %503, %504 : vector<16x32xf32>
    %506 = vector.broadcast %485 : vector<1x32xf32> to vector<16x32xf32>
    %507 = arith.addf %505, %506 : vector<16x32xf32>
    %c352 = arith.constant 352 : index
    %c0_154 = arith.constant 0 : index
    %508 = vector.load %arg2[%c352, %c0_154] : memref<544x128xbf16, #tpu.memory_space<vmem>>, vector<32x128xbf16>
    %509 = arith.truncf %507 : vector<16x32xf32> to vector<16x32xbf16>
    %cst_155 = arith.constant dense<0.000000e+00> : vector<16x128xf32>
    %510 = tpu.matmul %509, %508, %cst_155 {dimension_numbers = #tpu.dot_dimension_numbers<[1], [0], [0], [1], [0, 0, 1, 1], [], []>} : vector<16x32xbf16>, vector<32x128xbf16>, vector<16x128xf32> -> vector<16x128xf32>
    %c16 = arith.constant 16 : index
    %c0_156 = arith.constant 0 : index
    %511 = vector.load %arg3[%c16, %c0_156] : memref<37x128xf32, #tpu.memory_space<vmem>>, vector<1x128xf32>
    %512 = vector.broadcast %511 : vector<1x128xf32> to vector<16x128xf32>
    %513 = arith.addf %510, %512 : vector<16x128xf32>
    %514 = arith.mulf %513, %513 : vector<16x128xf32>
    %515 = arith.mulf %513, %514 : vector<16x128xf32>
    %cst_157 = arith.constant 4.471500e-02 : f32
    %516 = vector.broadcast %cst_157 : f32 to vector<16x128xf32>
    %517 = arith.mulf %516, %515 : vector<16x128xf32>
    %518 = arith.addf %513, %517 : vector<16x128xf32>
    %cst_158 = arith.constant 0.797884583 : f32
    %519 = vector.broadcast %cst_158 : f32 to vector<16x128xf32>
    %520 = arith.mulf %519, %518 : vector<16x128xf32>
    %521 = math.tanh %520 : vector<16x128xf32>
    %cst_159 = arith.constant 1.000000e+00 : f32
    %522 = vector.broadcast %cst_159 : f32 to vector<16x128xf32>
    %523 = arith.addf %522, %521 : vector<16x128xf32>
    %cst_160 = arith.constant 5.000000e-01 : f32
    %524 = vector.broadcast %cst_160 : f32 to vector<16x128xf32>
    %525 = arith.mulf %524, %523 : vector<16x128xf32>
    %526 = arith.mulf %513, %525 : vector<16x128xf32>
    %c384 = arith.constant 384 : index
    %c0_161 = arith.constant 0 : index
    %527 = vector.load %arg2[%c384, %c0_161] : memref<544x128xbf16, #tpu.memory_space<vmem>>, vector<128x32xbf16>
    %528 = arith.truncf %526 : vector<16x128xf32> to vector<16x128xbf16>
    %cst_162 = arith.constant dense<0.000000e+00> : vector<16x32xf32>
    %529 = tpu.matmul %528, %527, %cst_162 {dimension_numbers = #tpu.dot_dimension_numbers<[1], [0], [0], [1], [0, 0, 1, 1], [], []>} : vector<16x128xbf16>, vector<128x32xbf16>, vector<16x32xf32> -> vector<16x32xf32>
    %530 = arith.addf %483, %529 : vector<16x32xf32>
    %c17 = arith.constant 17 : index
    %c0_163 = arith.constant 0 : index
    %531 = vector.load %arg3[%c17, %c0_163] : memref<37x128xf32, #tpu.memory_space<vmem>>, vector<1x32xf32>
    %532 = vector.broadcast %531 : vector<1x32xf32> to vector<16x32xf32>
    %533 = arith.addf %530, %532 : vector<16x32xf32>
    %c512 = arith.constant 512 : index
    %c0_164 = arith.constant 0 : index
    %534 = vector.load %arg2[%c512, %c0_164] : memref<544x128xbf16, #tpu.memory_space<vmem>>, vector<32x32xbf16>
    %535 = arith.truncf %533 : vector<16x32xf32> to vector<16x32xbf16>
    %cst_165 = arith.constant dense<0.000000e+00> : vector<16x32xf32>
    %536 = tpu.matmul %535, %534, %cst_165 {dimension_numbers = #tpu.dot_dimension_numbers<[1], [0], [0], [1], [0, 0, 1, 1], [], []>} : vector<16x32xbf16>, vector<32x32xbf16>, vector<16x32xf32> -> vector<16x32xf32>
    %c18 = arith.constant 18 : index
    %c0_166 = arith.constant 0 : index
    %537 = vector.load %arg3[%c18, %c0_166] : memref<37x128xf32, #tpu.memory_space<vmem>>, vector<1x32xf32>
    %538 = vector.broadcast %537 : vector<1x32xf32> to vector<16x32xf32>
    %539 = arith.addf %536, %538 : vector<16x32xf32>
    %540 = math.tanh %539 : vector<16x32xf32>
    %c19 = arith.constant 19 : index
    %c0_167 = arith.constant 0 : index
    %541 = vector.load %arg3[%c19, %c0_167] : memref<37x128xf32, #tpu.memory_space<vmem>>, vector<1x32xf32>
    %542 = vector.broadcast %541 : vector<1x32xf32> to vector<16x32xf32>
    %543 = arith.mulf %540, %542 : vector<16x32xf32>
    %cst_168 = arith.constant dense<0.000000e+00> : vector<16xf32>
    %544 = vector.multi_reduction <add>, %543, %cst_168 [1] : vector<16x32xf32> to vector<16xf32>
    %545 = vector.shape_cast %544 : vector<16xf32> to vector<16x1xf32>
    %c20 = arith.constant 20 : index
    %c0_169 = arith.constant 0 : index
    %546 = vector.load %arg3[%c20, %c0_169] : memref<37x128xf32, #tpu.memory_space<vmem>>, vector<1x1xf32>
    %547 = vector.broadcast %546 : vector<1x1xf32> to vector<16x1xf32>
    %548 = arith.addf %545, %547 : vector<16x1xf32>
    %549 = math.exp %548 : vector<16x1xf32>
    %550 = arith.mulf %549, %6 : vector<16x1xf32>
    %551 = vector.extract_strided_slice %550 {offsets = [0, 0], sizes = [8, 1], strides = [1, 1]} : vector<16x1xf32> to vector<8x1xf32>
    %cst_170 = arith.constant dense<0.000000e+00> : vector<1xf32>
    %552 = vector.multi_reduction <add>, %551, %cst_170 [0] : vector<8x1xf32> to vector<1xf32>
    %553 = vector.shape_cast %552 : vector<1xf32> to vector<1x1xf32>
    %554 = vector.extract_strided_slice %5 {offsets = [0, 0], sizes = [16, 1], strides = [1, 1]} : vector<16x2xf32> to vector<16x1xf32>
    %555 = vector.broadcast %553 : vector<1x1xf32> to vector<16x1xf32>
    %556 = arith.mulf %554, %555 : vector<16x1xf32>
    %cst_171 = arith.constant 0.000000e+00 : f32
    %557 = vector.broadcast %cst_171 : f32 to vector<16x1xf32>
    %558 = arith.addf %557, %556 : vector<16x1xf32>
    %559 = vector.extract_strided_slice %550 {offsets = [8, 0], sizes = [8, 1], strides = [1, 1]} : vector<16x1xf32> to vector<8x1xf32>
    %cst_172 = arith.constant dense<0.000000e+00> : vector<1xf32>
    %560 = vector.multi_reduction <add>, %559, %cst_172 [0] : vector<8x1xf32> to vector<1xf32>
    %561 = vector.shape_cast %560 : vector<1xf32> to vector<1x1xf32>
    %562 = vector.extract_strided_slice %5 {offsets = [0, 1], sizes = [16, 1], strides = [1, 1]} : vector<16x2xf32> to vector<16x1xf32>
    %563 = vector.broadcast %561 : vector<1x1xf32> to vector<16x1xf32>
    %564 = arith.mulf %562, %563 : vector<16x1xf32>
    %565 = arith.addf %558, %564 : vector<16x1xf32>
    %cst_173 = arith.constant 9.99999993E-9 : f32
    %566 = vector.broadcast %cst_173 : f32 to vector<16x1xf32>
    %567 = arith.addf %565, %566 : vector<16x1xf32>
    %568 = tpu.reciprocal %567 {approx = true} : vector<16x1xf32> -> vector<16x1xf32>
    %569 = arith.mulf %550, %568 : vector<16x1xf32>
    %570 = vector.broadcast %569 : vector<16x1xf32> to vector<16x32xf32>
    %571 = arith.mulf %533, %570 : vector<16x32xf32>
    %572 = arith.truncf %4 : vector<2x16xf32> to vector<2x16xbf16>
    %573 = arith.truncf %571 : vector<16x32xf32> to vector<16x32xbf16>
    %cst_174 = arith.constant dense<0.000000e+00> : vector<2x32xf32>
    %574 = tpu.matmul %572, %573, %cst_174 {dimension_numbers = #tpu.dot_dimension_numbers<[1], [0], [0], [1], [0, 0, 1, 1], [], []>} : vector<2x16xbf16>, vector<16x32xbf16>, vector<2x32xf32> -> vector<2x32xf32>
    %c0_175 = arith.constant 0 : index
    %c0_176 = arith.constant 0 : index
    %575 = vector.load %arg5[%c0_175, %c0_176] : memref<2x32xf32, #tpu.memory_space<vmem>>, vector<2x32xf32>
    tpu.vector_store %arg5[%c0_175, %c0_176], %574 {strides = array<i32>} : memref<2x32xf32, #tpu.memory_space<vmem>>, vector<2x32xf32>,
    return
  }
}

</mosaic_0001>

<bundles_post_ra>
// kernel: performer_encoder_forward.1
= control target key start
LH: loop header
LB: loop body
LE: loop exit
PB: predicated region body
PF: predicated region fallthrough
CT: control target
= control target key end

     0   :  { %10 = vsyncpa [#allocation3], 0  ;;  %s3493_s0 = inlined_call_operand.vmem [shape: f32[16,32], index: 0, kind: input, shape index: {}]   ;;  %s3494_s1 = inlined_call_operand.vmem [shape: f32[16,1], index: 1, kind: input, shape index: {}]   ;;  %s3495_s2 = inlined_call_operand.hbm [shape: bf16[544,128], index: 2, kind: input, shape index: {}]   ;;  %s3496_s3 = inlined_call_operand.hbm [shape: f32[37,128], index: 3, kind: input, shape index: {}]   ;;  %s3497_s4 = inlined_call_operand.hbm [shape: f32[70,128], index: 4, kind: input, shape index: {}]   ;;  %s3498_s5 = inlined_call_operand.hbm [shape: f32[2,32], index: 5, kind: output, shape index: {}]  }
   0x1   :  { %11 = vsyncpa [#allocation6], 0 }
   0x2   :  { %12 = vsyncpa [#allocation4], 0  ;;  %s2911_s18 = smov [#allocation5]   ;;  %s2817_s22 = scalar_lea.hbm %s3496_s3, 640 }
   0x3   :  { %s34_s19 = sshll.u32 %s2911_s18, 4  ;;  %p2818_p0 = scmp.ne.s32.totalorder %s3496_s3, %s2817_s22  ;;  %s35_s19 = int_to_ptr.vmem [resolvable:$true] %s34_s19 }
   0x4   :  { %p2821_p1 = scmp.lt.u32.totalorder %s2817_s22, %s3496_s3 }
   0x6   :  { %p2823_p2 = pnand %p2821_p1, %p2818_p0 }
   0x8   :  { %2826 = shalt.err (!%p2823_p2)
}
   0x9   :  { %s2827_s27 = scalar_lea.vmem %s35_s19, 640  ;;  %p2832_p4 = scmp.lt.s32.totalorder %s35_s19, %s35_s19 }
   0xa   :  { %p2828_p3 = scmp.ne.s32.totalorder %s35_s19, %s2827_s27  ;;  %p2833_p5 = scmp.lt.s32.totalorder %s2827_s27, %s2827_s27 }
   0xc   :  { %p2834_p6 = por %p2833_p5, %p2832_p4 }
   0xe   :  { %p2835_p7 = pnand %p2834_p6, %p2828_p3 }
  0x10   :  { %2838 = shalt.err (!%p2835_p7)
}
  0x11   :  { %s2912_s28 = smov 128   ;;  %s2913_s29 = smov 8  }
  0x12   :  { %40 = dma.hbm_to_vmem [thread:$0]  %s3496_s3, 640, %s35_s19, [#allocation6], %s2912_s28, %s2912_s28, %s2913_s29  }
  0x13   :  { %s2914_s7 = smov [#allocation2]   ;;  %s2839_s11 = scalar_lea.hbm %s3495_s2, 4352 }
  0x14   :  { %s22_s8 = sshll.u32 %s2914_s7, 4  ;;  %p2840_p8 = scmp.ne.s32.totalorder %s3495_s2, %s2839_s11  ;;  %s23_s8 = int_to_ptr.vmem [resolvable:$true] %s22_s8 }
  0x15   :  { %p2843_p9 = scmp.lt.u32.totalorder %s2839_s11, %s3495_s2 }
  0x17   :  { %p2845_p10 = pnand %p2843_p9, %p2840_p8 }
  0x19   :  { %2848 = shalt.err (!%p2845_p10)
}
  0x1a   :  { %s2849_s16 = scalar_lea.vmem %s23_s8, 4352  ;;  %p2854_p12 = scmp.lt.s32.totalorder %s23_s8, %s23_s8 }
  0x1b   :  { %p2850_p11 = scmp.ne.s32.totalorder %s23_s8, %s2849_s16  ;;  %p2855_p13 = scmp.lt.s32.totalorder %s2849_s16, %s2849_s16 }
  0x1d   :  { %p2856_p0 = por %p2855_p13, %p2854_p12 }
  0x1f   :  { %p2857_p1 = pnand %p2856_p0, %p2850_p11 }
  0x21   :  { %2860 = shalt.err (!%p2857_p1)
}
  0x22   :  { %s2915_s3 = smov 64   ;;  %s2916_s17 = smov 4  }
  0x23   :  { %28 = dma.hbm_to_vmem [thread:$0]  %s3495_s2, 4352, %s23_s8, [#allocation3], %s2915_s3, %s2915_s3, %s2916_s17  }
  0x24   :  { %s2917_s20 = smov [#allocation7]   ;;  %s2861_s24 = scalar_lea.hbm %s3497_s4, 1152 }
  0x25   :  { %s46_s21 = sshll.u32 %s2917_s20, 4  ;;  %p2862_p2 = scmp.ne.s32.totalorder %s3497_s4, %s2861_s24  ;;  %s47_s21 = int_to_ptr.vmem [resolvable:$true] %s46_s21 }
  0x26   :  { %p2865_p3 = scmp.lt.u32.totalorder %s2861_s24, %s3497_s4 }
  0x28   :  { %p2867_p4 = pnand %p2865_p3, %p2862_p2 }
  0x2a   :  { %2870 = shalt.err (!%p2867_p4)
}
  0x2b   :  { %s2871_s6 = scalar_lea.vmem %s47_s21, 1152  ;;  %p2876_p6 = scmp.lt.s32.totalorder %s47_s21, %s47_s21 }
  0x2c   :  { %p2872_p5 = scmp.ne.s32.totalorder %s47_s21, %s2871_s6  ;;  %p2877_p7 = scmp.lt.s32.totalorder %s2871_s6, %s2871_s6 }
  0x2e   :  { %p2878_p8 = por %p2877_p7, %p2876_p6 }
  0x30   :  { %p2879_p9 = pnand %p2878_p8, %p2872_p5 }
  0x32   :  { %2882 = shalt.err (!%p2879_p9)
}
  0x33   :  { %52 = dma.hbm_to_vmem [thread:$0]  %s3497_s4, 1152, %s47_s21, [#allocation6], %s2912_s28, %s2912_s28, %s2913_s29  }
  0x34   :  { %2905 = dma.done.wait [#allocation3], 4352  }
  0x35   :  { %2906 = vsyncadd [#allocation3], 4294962944 }
  0x36   :  { %2907 = dma.done.wait [#allocation6], 1792  }
  0x37   :  { %2908 = vsyncadd [#allocation6], 4294965504  ;;  %v76_v0 = vld [vmem:[#allocation5 + $0x15] sm:$0xff]  ;;  %vm84_vm0 = vcmask 261120   ;;  %v77_v2 = vld [vmem:[#allocation5 + $0x1d] sm:$0xff]  ;;  %v2918_v47 = vmov 0.0  }
  0x38   :  { %v78_v1 = vld [vmem:[%s3493_s0] sm:$0xff]  ;;  %v79_v4 = vld [vmem:[%s3493_s0 + $0x8] sm:$0xff]  ;;  %v2323_v25 = vld [vmem:[#allocation5] ss:$0 sm:$0xff]  ;;  %2479 = vmatprep.subr.bf16.mxu1 %v2918_v47  ;;  %2495 = vmatprep.subr.bf16.mxu0 %v2918_v47  ;;  %vm2919_vm1 = vmmov 0   ;;  %s2920_s0 = smov 96  }
  0x39   :  { %v80_v3 = vadd.f32 %v78_v1, %v76_v0  ;;  %v81_v5 = vadd.f32 %v79_v4, %v77_v2  ;;  %v2324_v27 = vld [vmem:[#allocation5 + $0x1] ss:$0 sm:$0xff]  ;;  %v2709_v46 = vld [vmem:[#allocation2] sm:$0xff]   ;;  %v2710_v48 = vld [vmem:[#allocation2 + $0x8] sm:$0xff]   ;;  %2483 = vmatprep.mubr.msk.bf16.mxu1 %vm2919_vm1, %v2918_v47  ;;  %2499 = vmatprep.mubr.msk.bf16.mxu0 %vm2919_vm1, %v2918_v47  ;;  %s2922_s4 = smov 127   ;;  %vm647_vm5 = vcmask 130048  }
  0x3a   :  { %2480 = vmatpush3.bf16.msra.mxu1 %v2709_v46  ;;  %v2325_v57 = vld [vmem:[#allocation5 + $0x2] ss:$0 sm:$0xff]  ;;  %v2326_v61 = vld [vmem:[#allocation5 + $0x3] ss:$0 sm:$0xff]  ;;  %v2327_v4 = vld [vmem:[#allocation5 + $0x4] ss:$0 sm:$0xff] }
  0x3b   :  { %v85_v6 = vsel %vm84_vm0, %v80_v3, 0.0  ;;  %v88_v7 = vsel %vm84_vm0, %v81_v5, 0.0  ;;  %2481 = vmatprep.subr.bf16.mxu1 %v2918_v47  ;;  %v2711_v2 = vld [vmem:[#allocation2 + $0x10] sm:$0xff]   ;;  %vm2207_vm6 = vcmask 7168   ;;  %s2923_s14 = smov 1   ;;  %vm2305_vm7 = vcmask 254976  }
  0x3c   :  { %86 = vadd.xlane.f32.xlu0 %v85_v6  ;;  %2496 = vmatpush3.bf16.msra.mxu0 %v2711_v2 }
  0x3d   :  { %2497 = vmatprep.subr.bf16.mxu0 %v2918_v47 }
  0x3e   :  { %2482 = vmatpush3.bf16.msra.mxu1 %v2710_v48 }
  0x3f   :  { %2487 = vmatprep.subr.bf16.mxu1 %v2918_v47 }
  0x40   :  { %89 = vadd.xlane.f32.xlu0 %v88_v7 }
  0xc9   :  { %v87_v8 = vpop.xlane.xlu0 %86 }
  0xca   :  { %v92_v9 = vmul.f32 0.03125, %v87_v8 }
  0xcc   :  { %v94_v10 = vsub.f32 %v80_v3, %v92_v9  ;;  %v2712_v3 = vld [vmem:[#allocation2 + $0x18] sm:$0xff]  }
  0xcd   :  { %v90_v11 = vpop.xlane.xlu0 %89  ;;  %2498 = vmatpush3.bf16.msra.mxu0 %v2712_v3 }
  0xce   :  { %v93_v12 = vmul.f32 0.03125, %v90_v11  ;;  %v96_v13 = vmul.f32 %v94_v10, %v94_v10  ;;  %2511 = vmatprep.subr.bf16.mxu0 %v2918_v47 }
  0xd0   :  { %v95_v14 = vsub.f32 %v81_v5, %v93_v12  ;;  %v98_v15 = vsel %vm84_vm0, %v96_v13, 0.0  ;;  %v64_v12 = vld [vmem:[#allocation7 + $0x2] sm:$0xff]  ;;  %v65_v13 = vld [vmem:[#allocation7 + $0xa] sm:$0xff] }
  0xd1   :  { %99 = vadd.xlane.f32.xlu1 %v98_v15 }
  0xd2   :  { %v97_v16 = vmul.f32 %v95_v14, %v95_v14 }
  0xd4   :  { %v101_v17 = vsel %vm84_vm0, %v97_v16, 0.0  ;;  %v3044_v16 = vpack.c.bf16 %v65_v13, %v64_v12 }
  0xd5   :  { %102 = vadd.xlane.f32.xlu1 %v101_v17 }
 0x15e   :  { %v100_v18 = vpop.xlane.xlu1 %99 }
 0x15f   :  { %v104_v19 = vmul.f32 0.03125, %v100_v18 }
 0x161   :  { %v106_v20 = vadd.f32 1e-12, %v104_v19 }
 0x162   :  { %v103_v21 = vpop.xlane.xlu1 %102 }
 0x163   :  { %2743 = vrsqrt.f32 %v106_v20  ;;  %v105_v22 = vmul.f32 0.03125, %v103_v21  ;;  %v66_v20 = vld [vmem:[#allocation7 + $0x12] sm:$0xff]  ;;  %v67_v21 = vld [vmem:[#allocation7 + $0x1a] sm:$0xff] }
 0x165   :  { %v107_v23 = vadd.f32 1e-12, %v105_v22 }
 0x167   :  { %2745 = vrsqrt.f32 %v107_v23  ;;  %v3049_v23 = vpack.c.bf16 %v67_v21, %v66_v20  ;;  %v3123_v20 = vld [vmem:[#allocation7 + $0x3e] sm:$0xff]  ;;  %v3125_v21 = vld [vmem:[#allocation7 + $0x36] sm:$0xff] }
 0x16d   :  { %v2744_v24 = vpop.eup %2743 }
 0x16e   :  { %v110_v26 = vmul.f32 %v2744_v24, %v94_v10  ;;  %v2921_v24 = vmov 0  }
 0x16f   :  { %2708 = vset.pattern.permute.xlu1 %v2921_v24  ;;  %2707 = vset.pattern.permute.xlu0 %v2921_v24 }
 0x170   :  { %v116_v28 = vmul.f32 %v2323_v25, %v110_v26 }
 0x171   :  { %v2746_v29 = vpop.eup %2745 }
 0x172   :  { %v3009_v30 = vadd.f32 %v2324_v27, %v116_v28  ;;  %v111_v31 = vmul.f32 %v2746_v29, %v95_v14 }
 0x174   :  { %v126_v32 = vsel %vm84_vm0, %v3009_v30, 0.0  ;;  %v117_v33 = vmul.f32 %v2323_v25, %v111_v31 }
 0x175   :  { %127 = vadd.xlane.f32.xlu0 %v126_v32 }
 0x176   :  { %v3013_v34 = vadd.f32 %v2324_v27, %v117_v33 }
 0x178   :  { %v129_v35 = vsel %vm84_vm0, %v3013_v34, 0.0 }
 0x179   :  { %130 = vadd.xlane.f32.xlu1 %v129_v35 }
 0x202   :  { %v128_v36 = vpop.xlane.xlu0 %127 }
 0x203   :  { %v132_v37 = vmul.f32 0.03125, %v128_v36 }
 0x205   :  { %v134_v38 = vsub.f32 %v3009_v30, %v132_v37 }
 0x206   :  { %v131_v39 = vpop.xlane.xlu1 %130 }
 0x207   :  { %v133_v40 = vmul.f32 0.03125, %v131_v39  ;;  %v136_v41 = vmul.f32 %v134_v38, %v134_v38 }
 0x209   :  { %v135_v42 = vsub.f32 %v3013_v34, %v133_v40  ;;  %v138_v43 = vsel %vm84_vm0, %v136_v41, 0.0  ;;  %v442_v41 = vlaneseq }
 0x20a   :  { %139 = vadd.xlane.f32.xlu0 %v138_v43 }
 0x20b   :  { %v137_v44 = vmul.f32 %v135_v42, %v135_v42  ;;  %v443_v43 = vshrl.u32 %v442_v41, 7 }
 0x20d   :  { %v141_v45 = vsel %vm84_vm0, %v137_v44, 0.0  ;;  %v3085_v44 = vsub.s32 1, %v443_v43 }
 0x20e   :  { %142 = vadd.xlane.f32.xlu1 %v141_v45  ;;  %v3087_v45 = vsub.s32 0, %v443_v43 }
 0x297   :  { %v140_v49 = vpop.xlane.xlu0 %139 }
 0x298   :  { %v144_v50 = vmul.f32 0.03125, %v140_v49 }
 0x29a   :  { %v146_v51 = vadd.f32 1e-05, %v144_v50 }
 0x29b   :  { %v143_v52 = vpop.xlane.xlu1 %142 }
 0x29c   :  { %2747 = vrsqrt.f32 %v146_v51  ;;  %v145_v53 = vmul.f32 0.03125, %v143_v52 }
 0x29e   :  { %v147_v54 = vadd.f32 1e-05, %v145_v53 }
 0x2a0   :  { %2749 = vrsqrt.f32 %v147_v54 }
 0x2a6   :  { %v2748_v55 = vpop.eup %2747 }
 0x2a7   :  { %v150_v56 = vmul.f32 %v2748_v55, %v134_v38 }
 0x2a9   :  { %v156_v60 = vmul.f32 %v2325_v57, %v150_v56 }
 0x2aa   :  { %v2750_v58 = vpop.eup %2749 }
 0x2ab   :  { %v151_v59 = vmul.f32 %v2750_v58, %v135_v42  ;;  %v162_v63 = vadd.f32 %v2326_v61, %v156_v60  ;;  %v3082_v42 = vld [vmem:[#allocation7] sm:$0x3] }
 0x2ac   :  { %vm440_vm2 = vcmp.gt.f32.partialorder %v3082_v42, 0.5 }
 0x2ad   :  { %v157_v62 = vmul.f32 %v2325_v57, %v151_v59  ;;  %v441_v46 = vsel %vm440_vm2, 1, %v2921_v24 }
 0x2ae   :  { %v512_v48 = vrot.slane %v441_v46, %v3085_v44  ;;  %v445_v49 = vrot.slane %v441_v46, %v3087_v45 }
 0x2af   :  { %v163_v0 = vadd.f32 %v2326_v61, %v157_v62 }
 0x2b0   :  { %vm3095_vm3 = vcmp.eq.s32.totalorder %v512_v48, 1  ;;  %vm3099_vm4 = vcmp.eq.s32.totalorder %v445_v49, 1 }
 0x2b1   :  { %v168_v1 = vpack.c.bf16 %v163_v0, %v162_v63 }
 0x2b3   :  { %2484 = vmatmul.mubr.msk.bf16.vlgmr.msra.gmra.mrb[0].mxu1 %vm84_vm0, %v168_v1 }
 0x2b4   :  { %2491 = vmatprep.mubr.msk.bf16.mxu1 %vm2919_vm1, %v2918_v47  ;;  %2488 = vmatpush3.bf16.msra.mxu1 %v2711_v2 }
 0x2b5   :  { %2489 = vmatprep.subr.bf16.mxu1 %v2918_v47 }
 0x2b8   :  { %2490 = vmatpush3.bf16.msra.mxu1 %v2712_v3 }
 0x2b9   :  { %2503 = vmatprep.subr.bf16.mxu1 %v2918_v47 }
 0x386   :  { %v223_v5 = vpop.f32.mrb[0].mxu1 }
 0x387   :  { %v3036_v6 = vadd.f32 %v2327_v4, %v223_v5  ;;  %v2485_v7 = vpop.f32.mrb[1].mxu1 }
 0x388   :  { %v226_v8 = vpop.f32.mrb[2].mxu1 }
 0x389   :  { %v230_v9 = vmul.f32 0.5, %v3036_v6  ;;  %v3039_v10 = vadd.f32 %v2327_v4, %v226_v8  ;;  %v2486_v11 = vpop.f32.mrb[3].mxu1 }
 0x38b   :  { %v231_v14 = vmul.f32 0.5, %v3039_v10  ;;  %v655_v15 = vpack.c.bf16 %v3039_v10, %v3036_v6  ;;  %v340_v17 = vmul.f32 %v230_v9, %v230_v9 }
 0x38d   :  { %v341_v18 = vmul.f32 %v231_v14, %v231_v14  ;;  %v236_v19 = vpack.c.bf16 %v231_v14, %v230_v9 }
 0x38f   :  { %294 = vrot.lane.b32.xlu0 %v236_v19, %s2920_s0  ;;  %2492 = vmatmul.mubr.msk.bf16.vlgmr.msra.gmra.mrb[4].mxu1 %vm84_vm0, %v236_v19  ;;  %v342_v22 = vpack.c.bf16 %v341_v18, %v340_v17 }
 0x390   :  { %2504 = vmatpush3.bf16.msra.mxu1 %v3044_v16  ;;  %2507 = vmatprep.mubr.msk.bf16.mxu1 %vm2919_vm1, %v2918_v47 }
 0x391   :  { %392 = vrot.lane.b32.xlu1 %v342_v22, %s2920_s0  ;;  %2505 = vmatprep.subr.bf16.mxu1 %v2918_v47 }
 0x394   :  { %2506 = vmatpush3.bf16.msra.mxu1 %v3049_v23 }
 0x395   :  { %2519 = vmatprep.subr.bf16.mxu1 %v2918_v47 }
 0x397   :  { %2508 = vmatmul.mubr.msk.bf16.vlgmr.msra.gmra.mrb[8].mxu1 %vm84_vm0, %v342_v22 }
 0x398   :  { %2521 = vmatprep.mubr.msk.bf16.mxu1 %vm2919_vm1, %v2918_v47 }
 0x401   :  { %v295_v25 = vpop.permute.xlu0 %294 }
 0x402   :  { %2500 = vmatmul.mubr.msk.bf16.vlgmr.msra.gmra.mrb[0].mxu0 %vm84_vm0, %v295_v25 }
 0x403   :  { %2512 = vmatpush3.bf16.msra.mxu0 %v3044_v16  ;;  %2515 = vmatprep.mubr.msk.bf16.mxu0 %vm2919_vm1, %v2918_v47  ;;  %v393_v26 = vpop.permute.xlu1 %392 }
 0x404   :  { %2513 = vmatprep.subr.bf16.mxu0 %v2918_v47 }
 0x407   :  { %2514 = vmatpush3.bf16.msra.mxu0 %v3049_v23 }
 0x408   :  { %2525 = vmatprep.subr.bf16.mxu0 %v2918_v47 }
 0x40a   :  { %2516 = vmatmul.mubr.msk.bf16.vlgmr.msra.gmra.mrb[4].mxu0 %vm84_vm0, %v393_v26 }
 0x40b   :  { %2527 = vmatprep.mubr.msk.bf16.mxu0 %vm2919_vm1, %v2918_v47 }
 0x462   :  { %v3070_v27 = vpop.f32.mrb[4].mxu1 }
 0x463   :  { %v2493_v28 = vpop.f32.mrb[5].mxu1 }
 0x464   :  { %v3072_v29 = vpop.f32.mrb[6].mxu1 }
 0x465   :  { %v2494_v31 = vpop.f32.mrb[7].mxu1 }
 0x46a   :  { %v382_v32 = vpop.f32.mrb[8].mxu1 }
 0x46b   :  { %v3074_v33 = vmul.f32 0.5, %v382_v32  ;;  %v2509_v35 = vpop.f32.mrb[9].mxu1  ;;  %v447_v32 = vsel %vm3099_vm4, %v3070_v27, -1e+30 }
 0x46c   :  { %v385_v36 = vpop.f32.mrb[10].mxu1  ;;  %v514_v35 = vsel %vm3095_vm3, %v3070_v27, -1e+30 }
 0x46d   :  { %v576_v37 = vsub.f32 %v3070_v27, %v3074_v33  ;;  %v3078_v38 = vmul.f32 0.5, %v385_v36  ;;  %v2510_v39 = vpop.f32.mrb[11].mxu1  ;;  %v515_v36 = vsel %vm3095_vm3, %v3072_v29, -1e+30 }
 0x46e   :  { %v448_v39 = vsel %vm3099_vm4, %v3072_v29, -1e+30 }
 0x46f   :  { %v577_v40 = vsub.f32 %v3072_v29, %v3078_v38 }
 0x4d5   :  { %v3091_v50 = vpop.f32.mrb[0].mxu0 }
 0x4d6   :  { %v2501_v51 = vpop.f32.mrb[1].mxu0  ;;  %v528_v58 = vsel %vm3095_vm3, %v3091_v50, -1e+30  ;;  %v461_v59 = vsel %vm3099_vm4, %v3091_v50, -1e+30 }
 0x4d7   :  { %v3093_v52 = vpop.f32.mrb[2].mxu0 }
 0x4d8   :  { %v2502_v55 = vpop.f32.mrb[3].mxu0  ;;  %v529_v56 = vsel %vm3095_vm3, %v3093_v52, -1e+30  ;;  %v462_v57 = vsel %vm3099_vm4, %v3093_v52, -1e+30 }
 0x4d9   :  { %542 = vmax.xlane.f32.xlu0 %v529_v56  ;;  %475 = vmax.xlane.f32.xlu1 %v462_v57 }
 0x4dd   :  { %v431_v60 = vpop.f32.mrb[4].mxu0  ;;  %530 = vmax.xlane.f32.xlu1 %v528_v58  ;;  %463 = vmax.xlane.f32.xlu0 %v461_v59 }
 0x4de   :  { %v3115_v61 = vmul.f32 0.5, %v431_v60  ;;  %v2517_v62 = vpop.f32.mrb[5].mxu0 }
 0x4df   :  { %v434_v63 = vpop.f32.mrb[6].mxu0 }
 0x4e0   :  { %v588_v0 = vsub.f32 %v3091_v50, %v3115_v61  ;;  %v3119_v1 = vmul.f32 0.5, %v434_v63  ;;  %v2518_v2 = vpop.f32.mrb[7].mxu0 }
 0x4e2   :  { %v589_v3 = vsub.f32 %v3093_v52, %v3119_v1  ;;  %v3194_v52 = vld [vmem:[#allocation7 + $0x24] sm:$0xff] }
 0x566   :  { %v543_v4 = vpop.xlane.xlu0 %542  ;;  %v476_v5 = vpop.xlane.xlu1 %475 }
 0x567   :  { %v544_v7 = vrot.slane %v543_v4, 4  ;;  %v477_v8 = vrot.slane %v476_v5, 4 }
 0x569   :  { %v545_v9 = vmax.f32 %v543_v4, %v544_v7  ;;  %v478_v11 = vmax.f32 %v476_v5, %v477_v8 }
 0x56a   :  { %v464_v41 = vpop.xlane.xlu0 %463  ;;  %v531_v46 = vpop.xlane.xlu1 %530 }
 0x56b   :  { %v546_v12 = vrot.slane %v545_v9, 2  ;;  %v479_v13 = vrot.slane %v478_v11, 2  ;;  %v465_v43 = vrot.slane %v464_v41, 4  ;;  %v532_v48 = vrot.slane %v531_v46, 4 }
 0x56d   :  { %v547_v14 = vmax.f32 %v545_v9, %v546_v12  ;;  %v480_v17 = vmax.f32 %v478_v11, %v479_v13  ;;  %v466_v49 = vmax.f32 %v464_v41, %v465_v43  ;;  %v533_v51 = vmax.f32 %v531_v46, %v532_v48 }
 0x56f   :  { %v548_v18 = vrot.slane %v547_v14, 1  ;;  %v481_v19 = vrot.slane %v480_v17, 1  ;;  %v467_v55 = vrot.slane %v466_v49, 2  ;;  %v534_v56 = vrot.slane %v533_v51, 2 }
 0x571   :  { %v482_v22 = vmax.f32 %v480_v17, %v481_v19  ;;  %v549_v24 = vmax.f32 %v547_v14, %v548_v18  ;;  %v468_v57 = vmax.f32 %v466_v49, %v467_v55  ;;  %v535_v58 = vmax.f32 %v533_v51, %v534_v56 }
 0x573   :  { %v484_v25 = vmul.f32 %v482_v22, %v3123_v20  ;;  %v483_v26 = vmul.f32 %v482_v22, %v3125_v21  ;;  %v550_v28 = vmul.f32 %v549_v24, %v3125_v21  ;;  %v551_v31 = vmul.f32 %v549_v24, %v3123_v20 }
 0x574   :  { %v469_v59 = vrot.slane %v468_v57, 1  ;;  %v536_v60 = vrot.slane %v535_v58, 1  ;;  %v3157_v22 = vrot.slane %v3082_v42, %v3085_v44  ;;  %v3161_v24 = vrot.slane %v3082_v42, %v3087_v45 }
 0x575   :  { %489 = vrot.lane.b32.xlu1 %v484_v25, %s2922_s4  ;;  %487 = vrot.lane.b32.xlu0 %v483_v26, %s2922_s4 }
 0x576   :  { %v470_v62 = vmax.f32 %v468_v57, %v469_v59  ;;  %v537_v4 = vmax.f32 %v535_v58, %v536_v60 }
 0x578   :  { %v472_v63 = vmul.f32 %v470_v62, %v3123_v20  ;;  %v471_v2 = vmul.f32 %v470_v62, %v3125_v21  ;;  %v538_v11 = vmul.f32 %v537_v4, %v3125_v21  ;;  %v539_v14 = vmul.f32 %v537_v4, %v3123_v20 }
 0x579   :  { %554 = vrot.lane.b32.xlu1 %v550_v28, %s2922_s4 }
 0x57d   :  { %556 = vrot.lane.b32.xlu1 %v551_v31, %s2922_s4 }
 0x594   :  { %449 = vmax.xlane.f32.xlu0 %v447_v32 }
 0x598   :  { %516 = vmax.xlane.f32.xlu0 %v514_v35 }
 0x59c   :  { %518 = vmax.xlane.f32.xlu0 %v515_v36 }
 0x5a1   :  { %451 = vmax.xlane.f32.xlu1 %v448_v39 }
 0x5e7   :  { %v490_v5 = vpop.permute.xlu1 %489  ;;  %v488_v7 = vpop.permute.xlu0 %487 }
 0x5e8   :  { %v494_v8 = vadd.f32 %v490_v5, %v472_v63  ;;  %v493_v9 = vadd.f32 %v488_v7, %v471_v2 }
 0x5ea   :  { %502 = vperm.xlu1 %2708, %v494_v8   ;;  %497 = vperm.xlu0 %2707, %v493_v9  }
 0x5eb   :  { %v555_v12 = vpop.permute.xlu1 %554 }
 0x5ec   :  { %v560_v13 = vadd.f32 %v555_v12, %v538_v11 }
 0x5ee   :  { %564 = vperm.xlu1 %2708, %v560_v13  }
 0x5ef   :  { %v557_v17 = vpop.permute.xlu1 %556 }
 0x5f0   :  { %v561_v18 = vadd.f32 %v557_v17, %v539_v14 }
 0x5f2   :  { %569 = vperm.xlu1 %2708, %v561_v18  }
 0x5f6   :  { %657 = vrot.lane.b32.xlu1 %v655_v15, %s2915_s3 }
 0x621   :  { %v450_v19 = vpop.xlane.xlu0 %449 }
 0x622   :  { %v457_v26 = vmul.f32 %v3161_v24, %v450_v19 }
 0x625   :  { %v517_v25 = vpop.xlane.xlu0 %516 }
 0x626   :  { %v524_v28 = vmul.f32 %v3157_v22, %v517_v25 }
 0x628   :  { %v526_v31 = vadd.f32 %v524_v28, %v457_v26 }
 0x629   :  { %v519_v10 = vpop.xlane.xlu0 %518 }
 0x62a   :  { %v578_v6 = vsub.f32 %v576_v37, %v526_v31  ;;  %v525_v35 = vmul.f32 %v3157_v22, %v519_v10 }
 0x62c   :  { %v580_v15 = vmul.f32 1.442695, %v578_v6 }
 0x62e   :  { %v452_v32 = vpop.xlane.xlu1 %451  ;;  %2751 = vpow2.f32 %v580_v15 }
 0x62f   :  { %v458_v36 = vmul.f32 %v3161_v24, %v452_v32 }
 0x631   :  { %v527_v42 = vadd.f32 %v525_v35, %v458_v36 }
 0x633   :  { %v579_v39 = vsub.f32 %v577_v40, %v527_v42 }
 0x635   :  { %v582_v41 = vmul.f32 1.442695, %v579_v39 }
 0x637   :  { %2753 = vpow2.f32 %v582_v41 }
 0x638   :  { %v2752_v43 = vpop.eup %2751 }
 0x639   :  { %v584_v46 = vadd.f32 0.0001, %v2752_v43 }
 0x63b   :  { %v586_v27 = vmul.f32 0.15075567, %v584_v46 }
 0x63d   :  { %v600_v49 = vmul.f32 %v586_v27, %v3161_v24  ;;  %v716_v55 = vmul.f32 %v586_v27, %v3157_v22  ;;  %v2713_v27 = vld [vmem:[#allocation2 + $0x20] sm:$0xff]  }
 0x641   :  { %v2754_v48 = vpop.eup %2753 }
 0x642   :  { %v585_v33 = vadd.f32 0.0001, %v2754_v48 }
 0x644   :  { %v587_v37 = vmul.f32 0.15075567, %v585_v33  ;;  %v2714_v33 = vld [vmem:[#allocation2 + $0x28] sm:$0xff]  }
 0x646   :  { %v601_v51 = vmul.f32 %v587_v37, %v3161_v24  ;;  %v717_v56 = vmul.f32 %v587_v37, %v3157_v22 }
 0x648   :  { %v602_v57 = vpack.c.bf16 %v601_v51, %v600_v49  ;;  %v718_v58 = vpack.c.bf16 %v717_v56, %v716_v55 }
 0x669   :  { %v503_v29 = vpop.permute.xlu1 %502  ;;  %v498_v38 = vpop.permute.xlu0 %497 }
 0x66a   :  { %v505_v59 = vmul.f32 %v498_v38, %v3161_v24  ;;  %v506_v2 = vmul.f32 %v503_v29, %v3161_v24  ;;  %v68_v38 = vld [vmem:[#allocation7 + $0x22] sm:$0x3] }
 0x66d   :  { %v565_v40 = vpop.permute.xlu1 %564 }
 0x66e   :  { %v572_v60 = vmul.f32 %v565_v40, %v3157_v22 }
 0x670   :  { %v574_v62 = vadd.f32 %v572_v60, %v505_v59 }
 0x671   :  { %v570_v63 = vpop.permute.xlu1 %569 }
 0x672   :  { %v590_v4 = vsub.f32 %v588_v0, %v574_v62  ;;  %v573_v5 = vmul.f32 %v570_v63, %v3157_v22  ;;  %v3216_v62 = vrot.slane %v68_v38, %v3087_v45  ;;  %v3219_v63 = vrot.slane %v68_v38, %v3085_v44 }
 0x674   :  { %v592_v7 = vmul.f32 1.442695, %v590_v4  ;;  %v575_v8 = vadd.f32 %v573_v5, %v506_v2 }
 0x675   :  { %v658_v9 = vpop.permute.xlu1 %657 }
 0x676   :  { %2755 = vpow2.f32 %v592_v7  ;;  %v591_v11 = vsub.f32 %v589_v3, %v575_v8  ;;  %2526 = vmatpush3.bf16.msra.mxu0 %v658_v9  ;;  %v3196_v3 = vld [vmem:[#allocation7 + $0x2c] sm:$0xff] }
 0x677   :  { %2537 = vmatprep.subr.bf16.mxu0 %v2918_v47 }
 0x678   :  { %v594_v12 = vmul.f32 1.442695, %v591_v11 }
 0x67a   :  { %2757 = vpow2.f32 %v594_v12 }
 0x680   :  { %v2756_v13 = vpop.eup %2755 }
 0x681   :  { %v596_v14 = vadd.f32 0.0001, %v2756_v13 }
 0x683   :  { %v598_v61 = vmul.f32 0.15075567, %v596_v14 }
 0x684   :  { %v2758_v17 = vpop.eup %2757 }
 0x685   :  { %v597_v50 = vadd.f32 0.0001, %v2758_v17 }
 0x687   :  { %v599_v0 = vmul.f32 0.15075567, %v597_v50 }
 0x689   :  { %v603_v18 = vpack.c.bf16 %v599_v0, %v598_v61 }
 0x68b   :  { %2520 = vmatpush3.bf16.xpose.msra.mxu1 %v603_v18 }
 0x68c   :  { %2531 = vmatprep.subr.bf16.mxu1 %v2918_v47 }
 0x692   :  { %2522 = vmatmul.mubr.bf16.vlgmr.msra.gmra.mrb[12].mxu1 %v602_v57 }
 0x693   :  { %2532 = vmatpush3.bf16.xpose.msra.mxu1 %v603_v18  ;;  %2533 = vmatprep.mubr.msk.bf16.mxu1 %vm2919_vm1, %v2918_v47 }
 0x694   :  { %2543 = vmatprep.subr.bf16.mxu1 %v2918_v47 }
 0x69a   :  { %2534 = vmatmul.mubr.bf16.vlgmr.msra.gmra.mrb[16].mxu1 %v718_v58 }
 0x69b   :  { %2547 = vmatprep.mubr.msk.bf16.mxu1 %vm2919_vm1, %v2918_v47  ;;  %2544 = vmatpush3.bf16.msra.mxu1 %v2713_v27  ;;  %v2715_v27 = vld [vmem:[#allocation2 + $0x30] sm:$0xff]  }
 0x69c   :  { %2545 = vmatprep.subr.bf16.mxu1 %v2918_v47 }
 0x69f   :  { %2546 = vmatpush3.bf16.msra.mxu1 %v2714_v33  ;;  %v2716_v33 = vld [vmem:[#allocation2 + $0x38] sm:$0xff]  }
 0x6a0   :  { %2559 = vmatprep.subr.bf16.mxu1 %v2918_v47 }
 0x765   :  { %v638_v1 = vpop.f32.mrb[12].mxu1 }
 0x766   :  { %v645_v19 = vmul.f32 %v638_v1, %v3194_v52  ;;  %v2523_v25 = vpop.f32.mrb[13].mxu1  ;;  %v2342_v1 = vld [vmem:[#allocation5 + $0x5] ss:$0 sm:$0xff] }
 0x767   :  { %v641_v26 = vpop.f32.mrb[14].mxu1 }
 0x768   :  { %v646_v28 = vmul.f32 %v641_v26, %v3196_v3  ;;  %v2524_v31 = vpop.f32.mrb[15].mxu1  ;;  %v648_v6 = vsel %vm647_vm5, %v645_v19, 0.0 }
 0x769   :  { %649 = vadd.xlane.f32.xlu1 %v648_v6 }
 0x76a   :  { %v654_v10 = vpack.c.bf16 %v646_v28, %v645_v19  ;;  %v651_v15 = vsel %vm647_vm5, %v646_v28, 0.0 }
 0x76b   :  { %652 = vadd.xlane.f32.xlu0 %v651_v15 }
 0x76c   :  { %2528 = vmatmul.mubr.msk.bf16.vlgmr.msra.gmra.mrb[8].mxu0 %vm647_vm5, %v654_v10 }
 0x76d   :  { %2538 = vmatpush3.bf16.msra.mxu0 %v658_v9  ;;  %v753_v32 = vpop.f32.mrb[16].mxu1  ;;  %2539 = vmatprep.mubr.msk.bf16.mxu0 %vm2919_vm1, %v2918_v47 }
 0x76e   :  { %v760_v35 = vmul.f32 %v753_v32, %v3194_v52  ;;  %v2535_v36 = vpop.f32.mrb[17].mxu1  ;;  %2551 = vmatprep.subr.bf16.mxu0 %v2918_v47 }
 0x76f   :  { %v756_v42 = vpop.f32.mrb[18].mxu1 }
 0x770   :  { %v761_v39 = vmul.f32 %v756_v42, %v3196_v3  ;;  %v2536_v41 = vpop.f32.mrb[19].mxu1  ;;  %v762_v43 = vsel %vm647_vm5, %v760_v35, 0.0 }
 0x771   :  { %763 = vadd.xlane.f32.xlu1 %v762_v43 }
 0x772   :  { %v768_v46 = vpack.c.bf16 %v761_v39, %v760_v35  ;;  %v765_v48 = vsel %vm647_vm5, %v761_v39, 0.0 }
 0x774   :  { %2540 = vmatmul.mubr.msk.bf16.vlgmr.msra.gmra.mrb[12].mxu0 %vm647_vm5, %v768_v46 }
 0x775   :  { %766 = vadd.xlane.f32.xlu1 %v765_v48  ;;  %2555 = vmatprep.mubr.msk.bf16.mxu0 %vm2919_vm1, %v2918_v47 }
 0x776   :  { %2552 = vmatpush3.bf16.msra.mxu0 %v2715_v27 }
 0x777   :  { %2553 = vmatprep.subr.bf16.mxu0 %v2918_v47 }
 0x77a   :  { %2554 = vmatpush3.bf16.msra.mxu0 %v2716_v33 }
 0x77b   :  { %2579 = vmatprep.subr.bf16.mxu0 %v2918_v47 }
 0x7f6   :  { %v650_v37 = vpop.xlane.xlu1 %649 }
 0x7f7   :  { %2759 = vrcp.f32 %v650_v37 }
 0x7f8   :  { %v653_v51 = vpop.xlane.xlu0 %652 }
 0x7f9   :  { %2761 = vrcp.f32 %v653_v51 }
 0x7fe   :  { %v764_v49 = vpop.xlane.xlu1 %763 }
 0x7ff   :  { %2763 = vrcp.f32 %v764_v49 }
 0x801   :  { %v2760_v40 = vpop.eup %2759 }
 0x802   :  { %v767_v55 = vpop.xlane.xlu1 %766 }
 0x803   :  { %2765 = vrcp.f32 %v767_v55  ;;  %v2762_v59 = vpop.eup %2761 }
 0x809   :  { %v2764_v2 = vpop.eup %2763 }
 0x80d   :  { %v2766_v9 = vpop.eup %2765 }
 0x83f   :  { %v697_v56 = vpop.f32.mrb[8].mxu0 }
 0x840   :  { %v2529_v57 = vpop.f32.mrb[9].mxu0  ;;  %v706_v60 = vmul.f32 %v2760_v40, %v697_v56 }
 0x841   :  { %v700_v58 = vpop.f32.mrb[10].mxu0 }
 0x842   :  { %v2530_v29 = vpop.f32.mrb[11].mxu0  ;;  %v707_v5 = vmul.f32 %v2762_v59, %v700_v58  ;;  %v712_v12 = vmul.f32 %v3216_v62, %v706_v60 }
 0x843   :  { %v2343_v29 = vld [vmem:[#allocation5 + $0x6] ss:$0 sm:$0xff] }
 0x844   :  { %v713_v50 = vmul.f32 %v3216_v62, %v707_v5 }
 0x847   :  { %v806_v4 = vpop.f32.mrb[12].mxu0 }
 0x848   :  { %v815_v7 = vmul.f32 %v2764_v2, %v806_v4  ;;  %v2541_v8 = vpop.f32.mrb[13].mxu0  ;;  %v2344_v2 = vld [vmem:[#allocation5 + $0x7] ss:$0 sm:$0xff] }
 0x849   :  { %v809_v11 = vpop.f32.mrb[14].mxu0 }
 0x84a   :  { %v821_v13 = vmul.f32 %v3219_v63, %v815_v7  ;;  %v816_v14 = vmul.f32 %v2766_v9, %v809_v11  ;;  %v2542_v17 = vpop.f32.mrb[15].mxu0  ;;  %v2717_v9 = vld [vmem:[#allocation2 + $0x40] sm:$0xff]   ;;  %v2718_v11 = vld [vmem:[#allocation2 + $0x48] sm:$0xff]  }
 0x84b   :  { %v2722_v17 = vld [vmem:[#allocation2 + $0x68] sm:$0xff]  }
 0x84c   :  { %v823_v45 = vadd.f32 %v821_v13, %v712_v12  ;;  %v822_v61 = vmul.f32 %v3219_v63, %v816_v14  ;;  %v2719_v12 = vld [vmem:[#allocation2 + $0x50] sm:$0xff]   ;;  %v2720_v13 = vld [vmem:[#allocation2 + $0x58] sm:$0xff]   ;;  %v2721_v14 = vld [vmem:[#allocation2 + $0x60] sm:$0xff]  }
 0x84e   :  { %v824_v44 = vadd.f32 %v822_v61, %v713_v50  ;;  %v2723_v50 = vld [vmem:[#allocation2 + $0x70] sm:$0xff]   ;;  %v2345_v61 = vld [vmem:[#allocation5 + $0x8] ss:$0 sm:$0xff] }
 0x850   :  { %v829_v0 = vpack.c.bf16 %v824_v44, %v823_v45  ;;  %v2724_v45 = vld [vmem:[#allocation2 + $0x78] sm:$0xff]  }
 0x852   :  { %2548 = vmatmul.mubr.msk.bf16.vlgmr.msra.gmra.mrb[20].mxu1 %vm84_vm0, %v829_v0 }
 0x853   :  { %2575 = vmatprep.mubr.msk.bf16.mxu1 %vm2919_vm1, %v2918_v47  ;;  %2560 = vmatpush3.bf16.msra.mxu1 %v2717_v9 }
 0x854   :  { %2561 = vmatprep.subr.bf16.mxu1 %v2918_v47 }
 0x857   :  { %2562 = vmatpush3.bf16.msra.mxu1 %v2718_v11 }
 0x858   :  { %2563 = vmatprep.subr.bf16.mxu1 %v2918_v47 }
 0x85b   :  { %2564 = vmatpush3.bf16.msra.mxu1 %v2719_v12 }
 0x85c   :  { %2565 = vmatprep.subr.bf16.mxu1 %v2918_v47 }
 0x85f   :  { %2566 = vmatpush3.bf16.msra.mxu1 %v2720_v13 }
 0x860   :  { %2567 = vmatprep.subr.bf16.mxu1 %v2918_v47 }
 0x863   :  { %2568 = vmatpush3.bf16.msra.mxu1 %v2721_v14  ;;  %v2725_v14 = vld [vmem:[#allocation2 + $0x80] sm:$0xff]  }
 0x864   :  { %2569 = vmatprep.subr.bf16.mxu1 %v2918_v47 }
 0x867   :  { %2570 = vmatpush3.bf16.msra.mxu1 %v2722_v17  ;;  %v2726_v17 = vld [vmem:[#allocation2 + $0x88] sm:$0xff]  }
 0x868   :  { %2571 = vmatprep.subr.bf16.mxu1 %v2918_v47 }
 0x86b   :  { %2572 = vmatpush3.bf16.msra.mxu1 %v2723_v50 }
 0x86c   :  { %2573 = vmatprep.subr.bf16.mxu1 %v2918_v47 }
 0x86f   :  { %2574 = vmatpush3.bf16.msra.mxu1 %v2724_v45 }
 0x870   :  { %2611 = vmatprep.subr.bf16.mxu1 %v2918_v47 }
 0x925   :  { %v879_v18 = vpop.f32.mrb[20].mxu1 }
 0x926   :  { %v886_v19 = vadd.f32 %v879_v18, %v3009_v30  ;;  %v2549_v25 = vpop.f32.mrb[21].mxu1 }
 0x927   :  { %v882_v26 = vpop.f32.mrb[22].mxu1 }
 0x928   :  { %v3229_v28 = vadd.f32 %v2342_v1, %v886_v19  ;;  %v887_v31 = vadd.f32 %v882_v26, %v3013_v34  ;;  %v2550_v6 = vpop.f32.mrb[23].mxu1 }
 0x92a   :  { %v3232_v10 = vadd.f32 %v2342_v1, %v887_v31  ;;  %v897_v15 = vsel %vm84_vm0, %v3229_v28, 0.0 }
 0x92b   :  { %898 = vadd.xlane.f32.xlu1 %v897_v15 }
 0x92c   :  { %v900_v32 = vsel %vm84_vm0, %v3232_v10, 0.0 }
 0x92d   :  { %901 = vadd.xlane.f32.xlu0 %v900_v32 }
 0x9b8   :  { %v899_v35 = vpop.xlane.xlu1 %898 }
 0x9b9   :  { %v903_v36 = vmul.f32 0.03125, %v899_v35 }
 0x9ba   :  { %v902_v30 = vpop.xlane.xlu0 %901 }
 0x9bb   :  { %v905_v42 = vsub.f32 %v3229_v28, %v903_v36  ;;  %v904_v39 = vmul.f32 0.03125, %v902_v30 }
 0x9bd   :  { %v906_v41 = vsub.f32 %v3232_v10, %v904_v39  ;;  %v907_v34 = vmul.f32 %v905_v42, %v905_v42 }
 0x9bf   :  { %v909_v43 = vsel %vm84_vm0, %v907_v34, 0.0  ;;  %v908_v46 = vmul.f32 %v906_v41, %v906_v41 }
 0x9c0   :  { %910 = vadd.xlane.f32.xlu1 %v909_v43 }
 0x9c1   :  { %v912_v48 = vsel %vm84_vm0, %v908_v46, 0.0 }
 0x9c2   :  { %913 = vadd.xlane.f32.xlu0 %v912_v48 }
 0xa4d   :  { %v911_v37 = vpop.xlane.xlu1 %910 }
 0xa4e   :  { %v915_v49 = vmul.f32 0.03125, %v911_v37 }
 0xa4f   :  { %v914_v51 = vpop.xlane.xlu0 %913 }
 0xa50   :  { %v917_v55 = vadd.f32 1e-05, %v915_v49  ;;  %v916_v56 = vmul.f32 0.03125, %v914_v51 }
 0xa52   :  { %2767 = vrsqrt.f32 %v917_v55  ;;  %v918_v57 = vadd.f32 1e-05, %v916_v56  ;;  %v2357_v55 = vld [vmem:[#allocation5 + $0x9] ss:$0 sm:$0xff] }
 0xa54   :  { %2769 = vrsqrt.f32 %v918_v57 }
 0xa5c   :  { %v2768_v58 = vpop.eup %2767 }
 0xa5d   :  { %v921_v38 = vmul.f32 %v2768_v58, %v905_v42 }
 0xa5e   :  { %v2770_v40 = vpop.eup %2769 }
 0xa5f   :  { %v927_v59 = vmul.f32 %v2343_v29, %v921_v38  ;;  %v922_v60 = vmul.f32 %v2770_v40, %v906_v41 }
 0xa61   :  { %v928_v4 = vmul.f32 %v2343_v29, %v922_v60  ;;  %v933_v5 = vadd.f32 %v2344_v2, %v927_v59 }
 0xa63   :  { %v934_v7 = vadd.f32 %v2344_v2, %v928_v4 }
 0xa65   :  { %v939_v8 = vpack.c.bf16 %v934_v7, %v933_v5 }
 0xa67   :  { %2556 = vmatmul.mubr.msk.bf16.vlgmr.msra.gmra.mrb[16].mxu0 %vm84_vm0, %v939_v8 }
 0xa68   :  { %2583 = vmatprep.mubr.msk.bf16.mxu0 %vm2919_vm1, %v2918_v47  ;;  %2580 = vmatpush3.bf16.msra.mxu0 %v2725_v14 }
 0xa69   :  { %2581 = vmatprep.subr.bf16.mxu0 %v2918_v47 }
 0xa6c   :  { %2582 = vmatpush3.bf16.msra.mxu0 %v2726_v17 }
 0xa6d   :  { %2587 = vmatprep.subr.bf16.mxu0 %v2918_v47 }
 0xb3a   :  { %v994_v44 = vpop.f32.mrb[16].mxu0 }
 0xb3b   :  { %v995_v0 = vadd.f32 %v2345_v61, %v994_v44  ;;  %v2557_v18 = vpop.f32.mrb[17].mxu0 }
 0xb3c   :  { %v997_v1 = vpop.f32.mrb[18].mxu0 }
 0xb3d   :  { %v1001_v19 = vmul.f32 %v995_v0, %v995_v0  ;;  %v998_v25 = vadd.f32 %v2345_v61, %v997_v1  ;;  %v2558_v26 = vpop.f32.mrb[19].mxu0 }
 0xb3f   :  { %v1003_v31 = vmul.f32 %v1001_v19, %v995_v0  ;;  %v1002_v6 = vmul.f32 %v998_v25, %v998_v25  ;;  %v2358_v19 = vld [vmem:[#allocation5 + $0xa] ss:$0 sm:$0xff] }
 0xb41   :  { %v1005_v15 = vmul.f32 0.044715, %v1003_v31  ;;  %v1004_v32 = vmul.f32 %v1002_v6, %v998_v25 }
 0xb43   :  { %v1007_v35 = vadd.f32 %v1005_v15, %v995_v0  ;;  %v1006_v36 = vmul.f32 0.044715, %v1004_v32  ;;  %v2359_v15 = vld [vmem:[#allocation5 + $0xb] ss:$0 sm:$0xff] }
 0xb45   :  { %v1009_v30 = vmul.f32 0.7978846, %v1007_v35  ;;  %v1008_v42 = vadd.f32 %v1006_v36, %v998_v25 }
 0xb47   :  { %2771 = vtanh.f32 %v1009_v30  ;;  %v1010_v39 = vmul.f32 0.7978846, %v1008_v42  ;;  %v2727_v42 = vld [vmem:[#allocation2 + $0x90] sm:$0xff]  }
 0xb49   :  { %2773 = vtanh.f32 %v1010_v39  ;;  %v2728_v39 = vld [vmem:[#allocation2 + $0x98] sm:$0xff]  }
 0xb51   :  { %v2772_v41 = vpop.eup %2771 }
 0xb52   :  { %v1013_v34 = vadd.f32 1.0, %v2772_v41  ;;  %v2360_v41 = vld [vmem:[#allocation5 + $0xc] ss:$0 sm:$0xff] }
 0xb53   :  { %v2774_v43 = vpop.eup %2773 }
 0xb54   :  { %v1015_v46 = vmul.f32 0.5, %v1013_v34  ;;  %v1014_v48 = vadd.f32 1.0, %v2774_v43 }
 0xb56   :  { %v1016_v27 = vmul.f32 0.5, %v1014_v48  ;;  %v1017_v33 = vmul.f32 %v1015_v46, %v995_v0 }
 0xb58   :  { %v1018_v37 = vmul.f32 %v1016_v27, %v998_v25 }
 0xb5a   :  { %v1035_v49 = vpack.c.bf16 %v1018_v37, %v1017_v33 }
 0xb5c   :  { %2576 = vmatmul.mubr.bf16.vlgmr.msra.gmra.mrb[24].mxu1 %v1035_v49 }
 0xb5d   :  { %2612 = vmatpush3.bf16.msra.mxu1 %v3044_v16  ;;  %2615 = vmatprep.mubr.msk.bf16.mxu1 %vm2919_vm1, %v2918_v47 }
 0xb5e   :  { %2613 = vmatprep.subr.bf16.mxu1 %v2918_v47 }
 0xb61   :  { %2614 = vmatpush3.bf16.msra.mxu1 %v3049_v23 }
 0xb62   :  { %2625 = vmatprep.subr.bf16.mxu1 %v2918_v47 }
 0xc2f   :  { %v1118_v51 = vpop.f32.mrb[24].mxu1 }
 0xc30   :  { %v1125_v56 = vadd.f32 %v1118_v51, %v3229_v28  ;;  %v2577_v57 = vpop.f32.mrb[25].mxu1 }
 0xc31   :  { %v1121_v58 = vpop.f32.mrb[26].mxu1 }
 0xc32   :  { %v3262_v29 = vadd.f32 %v2357_v55, %v1125_v56  ;;  %v1126_v38 = vadd.f32 %v1121_v58, %v3232_v10  ;;  %v2578_v40 = vpop.f32.mrb[27].mxu1 }
 0xc34   :  { %v3265_v59 = vadd.f32 %v2357_v55, %v1126_v38  ;;  %v1136_v60 = vsel %vm84_vm0, %v3262_v29, 0.0 }
 0xc35   :  { %1137 = vadd.xlane.f32.xlu1 %v1136_v60 }
 0xc36   :  { %v1139_v2 = vsel %vm84_vm0, %v3265_v59, 0.0 }
 0xc37   :  { %1140 = vadd.xlane.f32.xlu0 %v1139_v2 }
 0xcc2   :  { %v1138_v4 = vpop.xlane.xlu1 %1137 }
 0xcc3   :  { %v1142_v5 = vmul.f32 0.03125, %v1138_v4 }
 0xcc4   :  { %v1141_v28 = vpop.xlane.xlu0 %1140 }
 0xcc5   :  { %v1144_v7 = vsub.f32 %v3262_v29, %v1142_v5  ;;  %v1143_v8 = vmul.f32 0.03125, %v1141_v28 }
 0xcc7   :  { %v1145_v9 = vsub.f32 %v3265_v59, %v1143_v8  ;;  %v1146_v10 = vmul.f32 %v1144_v7, %v1144_v7 }
 0xcc9   :  { %v1148_v11 = vsel %vm84_vm0, %v1146_v10, 0.0  ;;  %v1147_v12 = vmul.f32 %v1145_v9, %v1145_v9 }
 0xcca   :  { %1149 = vadd.xlane.f32.xlu1 %v1148_v11 }
 0xccb   :  { %v1151_v13 = vsel %vm84_vm0, %v1147_v12, 0.0 }
 0xccc   :  { %1152 = vadd.xlane.f32.xlu0 %v1151_v13 }
 0xd57   :  { %v1150_v50 = vpop.xlane.xlu1 %1149 }
 0xd58   :  { %v1154_v45 = vmul.f32 0.03125, %v1150_v50 }
 0xd59   :  { %v1153_v61 = vpop.xlane.xlu0 %1152 }
 0xd5a   :  { %v1156_v44 = vadd.f32 1e-05, %v1154_v45  ;;  %v1155_v0 = vmul.f32 0.03125, %v1153_v61 }
 0xd5c   :  { %2775 = vrsqrt.f32 %v1156_v44  ;;  %v1157_v18 = vadd.f32 1e-05, %v1155_v0 }
 0xd5e   :  { %2777 = vrsqrt.f32 %v1157_v18 }
 0xd66   :  { %v2776_v1 = vpop.eup %2775 }
 0xd67   :  { %v1160_v25 = vmul.f32 %v2776_v1, %v1144_v7 }
 0xd68   :  { %v2778_v26 = vpop.eup %2777 }
 0xd69   :  { %v1166_v31 = vmul.f32 %v2358_v19, %v1160_v25  ;;  %v1161_v6 = vmul.f32 %v2778_v26, %v1145_v9 }
 0xd6b   :  { %v1167_v32 = vmul.f32 %v2358_v19, %v1161_v6  ;;  %v1172_v35 = vadd.f32 %v2359_v15, %v1166_v31 }
 0xd6d   :  { %v1173_v36 = vadd.f32 %v2359_v15, %v1167_v32 }
 0xd6f   :  { %v1178_v30 = vpack.c.bf16 %v1173_v36, %v1172_v35 }
 0xd71   :  { %2584 = vmatmul.mubr.msk.bf16.vlgmr.msra.gmra.mrb[20].mxu0 %vm84_vm0, %v1178_v30 }
 0xd72   :  { %2591 = vmatprep.mubr.msk.bf16.mxu0 %vm2919_vm1, %v2918_v47  ;;  %2588 = vmatpush3.bf16.msra.mxu0 %v2727_v42 }
 0xd73   :  { %2589 = vmatprep.subr.bf16.mxu0 %v2918_v47 }
 0xd76   :  { %2590 = vmatpush3.bf16.msra.mxu0 %v2728_v39 }
 0xd77   :  { %2595 = vmatprep.subr.bf16.mxu0 %v2918_v47 }
 0xe44   :  { %v1233_v34 = vpop.f32.mrb[20].mxu0 }
 0xe45   :  { %v3282_v43 = vadd.f32 %v2360_v41, %v1233_v34  ;;  %v2585_v46 = vpop.f32.mrb[21].mxu0 }
 0xe46   :  { %v1236_v48 = vpop.f32.mrb[22].mxu0 }
 0xe47   :  { %v1240_v27 = vmul.f32 0.5, %v3282_v43  ;;  %v3285_v33 = vadd.f32 %v2360_v41, %v1236_v48  ;;  %v2586_v37 = vpop.f32.mrb[23].mxu0 }
 0xe49   :  { %v1241_v49 = vmul.f32 0.5, %v3285_v33  ;;  %v1642_v51 = vpack.c.bf16 %v3285_v33, %v3282_v43  ;;  %v1350_v55 = vmul.f32 %v1240_v27, %v1240_v27 }
 0xe4b   :  { %v1351_v56 = vmul.f32 %v1241_v49, %v1241_v49  ;;  %v1246_v57 = vpack.c.bf16 %v1241_v49, %v1240_v27 }
 0xe4d   :  { %1304 = vrot.lane.b32.xlu1 %v1246_v57, %s2920_s0  ;;  %2592 = vmatmul.mubr.msk.bf16.vlgmr.msra.gmra.mrb[24].mxu0 %vm84_vm0, %v1246_v57  ;;  %v1352_v58 = vpack.c.bf16 %v1351_v56, %v1350_v55 }
 0xe4e   :  { %2596 = vmatpush3.bf16.msra.mxu0 %v2727_v42  ;;  %2599 = vmatprep.mubr.msk.bf16.mxu0 %vm2919_vm1, %v2918_v47 }
 0xe4f   :  { %1400 = vrot.lane.b32.xlu0 %v1352_v58, %s2920_s0  ;;  %2597 = vmatprep.subr.bf16.mxu0 %v2918_v47 }
 0xe52   :  { %2598 = vmatpush3.bf16.msra.mxu0 %v2728_v39 }
 0xe53   :  { %2603 = vmatprep.subr.bf16.mxu0 %v2918_v47 }
 0xebf   :  { %v1305_v38 = vpop.permute.xlu1 %1304 }
 0xec0   :  { %2600 = vmatmul.mubr.msk.bf16.vlgmr.msra.gmra.mrb[28].mxu0 %vm84_vm0, %v1305_v38 }
 0xec1   :  { %v1401_v40 = vpop.permute.xlu0 %1400  ;;  %2604 = vmatpush3.bf16.msra.mxu0 %v3044_v16  ;;  %2607 = vmatprep.mubr.msk.bf16.mxu0 %vm2919_vm1, %v2918_v47 }
 0xec2   :  { %2616 = vmatmul.mubr.msk.bf16.vlgmr.msra.gmra.mrb[28].mxu1 %vm84_vm0, %v1401_v40  ;;  %2605 = vmatprep.subr.bf16.mxu0 %v2918_v47 }
 0xec3   :  { %2627 = vmatprep.mubr.msk.bf16.mxu1 %vm2919_vm1, %v2918_v47 }
 0xec5   :  { %2606 = vmatpush3.bf16.msra.mxu0 %v3049_v23 }
 0xec6   :  { %2619 = vmatprep.subr.bf16.mxu0 %v2918_v47 }
 0xec8   :  { %2608 = vmatmul.mubr.msk.bf16.vlgmr.msra.gmra.mrb[32].mxu0 %vm84_vm0, %v1352_v58 }
 0xec9   :  { %2621 = vmatprep.mubr.msk.bf16.mxu0 %vm2919_vm1, %v2918_v47 }
 0xf20   :  { %v3310_v16 = vpop.f32.mrb[24].mxu0 }
 0xf21   :  { %v2593_v60 = vpop.f32.mrb[25].mxu0  ;;  %v1448_v38 = vsel %vm3099_vm4, %v3310_v16, -1e+30  ;;  %v1506_v40 = vsel %vm3095_vm3, %v3310_v16, -1e+30 }
 0xf22   :  { %v3312_v2 = vpop.f32.mrb[26].mxu0 }
 0xf23   :  { %v2594_v4 = vpop.f32.mrb[27].mxu0  ;;  %v1507_v60 = vsel %vm3095_vm3, %v3312_v2, -1e+30 }
 0xf24   :  { %v1449_v4 = vsel %vm3099_vm4, %v3312_v2, -1e+30 }
 0xf93   :  { %v3314_v5 = vpop.f32.mrb[28].mxu0 }
 0xf94   :  { %v2601_v28 = vpop.f32.mrb[29].mxu0  ;;  %v1516_v61 = vsel %vm3095_vm3, %v3314_v5, -1e+30  ;;  %v1458_v44 = vsel %vm3099_vm4, %v3314_v5, -1e+30 }
 0xf95   :  { %v3316_v7 = vpop.f32.mrb[30].mxu0  ;;  %v1439_v8 = vpop.f32.mrb[28].mxu1 }
 0xf96   :  { %v3318_v23 = vmul.f32 0.5, %v1439_v8  ;;  %v2602_v9 = vpop.f32.mrb[31].mxu0  ;;  %v2617_v10 = vpop.f32.mrb[29].mxu1  ;;  %v1517_v11 = vsel %vm3095_vm3, %v3316_v7, -1e+30 }
 0xf97   :  { %1530 = vmax.xlane.f32.xlu0 %v1517_v11  ;;  %v1459_v12 = vsel %vm3099_vm4, %v3316_v7, -1e+30  ;;  %v1442_v13 = vpop.f32.mrb[30].mxu1 }
 0xf98   :  { %v1576_v14 = vsub.f32 %v3314_v5, %v3318_v23  ;;  %1472 = vmax.xlane.f32.xlu1 %v1459_v12  ;;  %v3328_v17 = vmul.f32 0.5, %v1442_v13  ;;  %v2618_v50 = vpop.f32.mrb[31].mxu1 }
 0xf9a   :  { %v1577_v45 = vsub.f32 %v3316_v7, %v3328_v17 }
 0xf9b   :  { %1518 = vmax.xlane.f32.xlu0 %v1516_v61  ;;  %v1390_v0 = vpop.f32.mrb[32].mxu0 }
 0xf9c   :  { %1460 = vmax.xlane.f32.xlu1 %v1458_v44  ;;  %v3338_v18 = vmul.f32 0.5, %v1390_v0  ;;  %v2609_v1 = vpop.f32.mrb[33].mxu0 }
 0xf9d   :  { %v1393_v19 = vpop.f32.mrb[34].mxu0 }
 0xf9e   :  { %v1564_v25 = vsub.f32 %v3310_v16, %v3338_v18  ;;  %v3342_v26 = vmul.f32 0.5, %v1393_v19  ;;  %v2610_v31 = vpop.f32.mrb[35].mxu0 }
 0xfa0   :  { %v1565_v6 = vsub.f32 %v3312_v2, %v3342_v26 }
0x1024   :  { %v1531_v15 = vpop.xlane.xlu0 %1530 }
0x1025   :  { %v1532_v32 = vrot.slane %v1531_v15, 4  ;;  %v1473_v35 = vpop.xlane.xlu1 %1472 }
0x1026   :  { %v1474_v36 = vrot.slane %v1473_v35, 4 }
0x1027   :  { %v1533_v30 = vmax.f32 %v1531_v15, %v1532_v32 }
0x1028   :  { %v1475_v42 = vmax.f32 %v1473_v35, %v1474_v36  ;;  %v1519_v9 = vpop.xlane.xlu0 %1518 }
0x1029   :  { %v1534_v39 = vrot.slane %v1533_v30, 2  ;;  %v1461_v28 = vpop.xlane.xlu1 %1460  ;;  %v1520_v10 = vrot.slane %v1519_v9, 4 }
0x102a   :  { %v1476_v41 = vrot.slane %v1475_v42, 2  ;;  %v1462_v8 = vrot.slane %v1461_v28, 4 }
0x102b   :  { %v1535_v34 = vmax.f32 %v1533_v30, %v1534_v39  ;;  %v1521_v12 = vmax.f32 %v1519_v9, %v1520_v10 }
0x102c   :  { %v1477_v46 = vmax.f32 %v1475_v42, %v1476_v41  ;;  %v1463_v11 = vmax.f32 %v1461_v28, %v1462_v8 }
0x102d   :  { %v1536_v48 = vrot.slane %v1535_v34, 1  ;;  %v1522_v50 = vrot.slane %v1521_v12, 2 }
0x102e   :  { %v1478_v27 = vrot.slane %v1477_v46, 1  ;;  %v1464_v13 = vrot.slane %v1463_v11, 2 }
0x102f   :  { %v1537_v49 = vmax.f32 %v1535_v34, %v1536_v48  ;;  %v1523_v44 = vmax.f32 %v1521_v12, %v1522_v50 }
0x1030   :  { %v1479_v37 = vmax.f32 %v1477_v46, %v1478_v27  ;;  %v1465_v61 = vmax.f32 %v1463_v11, %v1464_v13 }
0x1031   :  { %v1538_v57 = vmul.f32 %v1537_v49, %v3125_v21  ;;  %v1539_v58 = vmul.f32 %v1537_v49, %v3123_v20  ;;  %v1524_v1 = vrot.slane %v1523_v44, 1 }
0x1032   :  { %v1481_v55 = vmul.f32 %v1479_v37, %v3123_v20  ;;  %v1480_v56 = vmul.f32 %v1479_v37, %v3125_v21  ;;  %v1466_v0 = vrot.slane %v1465_v61, 1 }
0x1033   :  { %v1525_v54 = vmax.f32 %v1523_v44, %v1524_v1 }
0x1034   :  { %1486 = vrot.lane.b32.xlu0 %v1481_v55, %s2922_s4  ;;  %1484 = vrot.lane.b32.xlu1 %v1480_v56, %s2922_s4  ;;  %v1467_v53 = vmax.f32 %v1465_v61, %v1466_v0 }
0x1035   :  { %v1526_v30 = vmul.f32 %v1525_v54, %v3125_v21  ;;  %v1527_v41 = vmul.f32 %v1525_v54, %v3123_v20 }
0x1036   :  { %v1469_v19 = vmul.f32 %v1467_v53, %v3123_v20  ;;  %v1468_v31 = vmul.f32 %v1467_v53, %v3125_v21 }
0x1038   :  { %1542 = vrot.lane.b32.xlu1 %v1538_v57, %s2922_s4 }
0x103c   :  { %1544 = vrot.lane.b32.xlu1 %v1539_v58, %s2922_s4 }
0x1053   :  { %1450 = vmax.xlane.f32.xlu0 %v1448_v38 }
0x1057   :  { %1508 = vmax.xlane.f32.xlu0 %v1506_v40 }
0x105b   :  { %1510 = vmax.xlane.f32.xlu0 %v1507_v60 }
0x1060   :  { %1452 = vmax.xlane.f32.xlu1 %v1449_v4 }
0x10a6   :  { %v1487_v15 = vpop.permute.xlu0 %1486  ;;  %v1485_v32 = vpop.permute.xlu1 %1484 }
0x10a7   :  { %v1491_v35 = vadd.f32 %v1487_v15, %v1469_v19  ;;  %v1490_v36 = vadd.f32 %v1485_v32, %v1468_v31 }
0x10a9   :  { %1499 = vperm.xlu0 %2707, %v1491_v35   ;;  %1494 = vperm.xlu1 %2708, %v1490_v36  }
0x10aa   :  { %v1543_v42 = vpop.permute.xlu1 %1542 }
0x10ab   :  { %v1548_v39 = vadd.f32 %v1543_v42, %v1526_v30 }
0x10ad   :  { %1644 = vrot.lane.b32.xlu0 %v1642_v51, %s2915_s3  ;;  %1552 = vperm.xlu1 %2708, %v1548_v39  }
0x10ae   :  { %v1545_v34 = vpop.permute.xlu1 %1544 }
0x10af   :  { %v1549_v46 = vadd.f32 %v1545_v34, %v1527_v41 }
0x10b1   :  { %1557 = vperm.xlu1 %2708, %v1549_v46  }
0x10e0   :  { %v1451_v48 = vpop.xlane.xlu0 %1450 }
0x10e1   :  { %v1454_v37 = vmul.f32 %v1451_v48, %v3161_v24 }
0x10e4   :  { %v1509_v27 = vpop.xlane.xlu0 %1508 }
0x10e5   :  { %v1512_v49 = vmul.f32 %v1509_v27, %v3157_v22 }
0x10e7   :  { %v1514_v21 = vadd.f32 %v1512_v49, %v1454_v37 }
0x10e8   :  { %v1511_v56 = vpop.xlane.xlu0 %1510 }
0x10e9   :  { %v1566_v55 = vsub.f32 %v1564_v25, %v1514_v21  ;;  %v1513_v51 = vmul.f32 %v1511_v56, %v3157_v22 }
0x10eb   :  { %v1568_v43 = vmul.f32 1.442695, %v1566_v55 }
0x10ed   :  { %v1453_v33 = vpop.xlane.xlu1 %1452  ;;  %2779 = vpow2.f32 %v1568_v43 }
0x10ee   :  { %v1455_v20 = vmul.f32 %v1453_v33, %v3161_v24 }
0x10f0   :  { %v1515_v57 = vadd.f32 %v1513_v51, %v1455_v20  ;;  %v2730_v51 = vld [vmem:[#allocation2 + $0xa8] sm:$0xff]  }
0x10f2   :  { %v1567_v58 = vsub.f32 %v1565_v6, %v1515_v57 }
0x10f4   :  { %v1570_v38 = vmul.f32 1.442695, %v1567_v58 }
0x10f6   :  { %2781 = vpow2.f32 %v1570_v38 }
0x10f7   :  { %v2780_v40 = vpop.eup %2779 }
0x10f8   :  { %v1572_v60 = vadd.f32 0.0001, %v2780_v40 }
0x10fa   :  { %v1574_v16 = vmul.f32 0.15075567, %v1572_v60 }
0x10fc   :  { %v1588_v28 = vmul.f32 %v1574_v16, %v3161_v24  ;;  %v1699_v9 = vmul.f32 %v1574_v16, %v3157_v22 }
0x1100   :  { %v2782_v4 = vpop.eup %2781 }
0x1101   :  { %v1573_v18 = vadd.f32 0.0001, %v2782_v4 }
0x1103   :  { %v1575_v25 = vmul.f32 0.15075567, %v1573_v18 }
0x1105   :  { %v1589_v8 = vmul.f32 %v1575_v25, %v3161_v24  ;;  %v1700_v10 = vmul.f32 %v1575_v25, %v3157_v22 }
0x1107   :  { %v1590_v11 = vpack.c.bf16 %v1589_v8, %v1588_v28  ;;  %v1701_v12 = vpack.c.bf16 %v1700_v10, %v1699_v9 }
0x1128   :  { %v1500_v2 = vpop.permute.xlu0 %1499  ;;  %v1495_v26 = vpop.permute.xlu1 %1494 }
0x1129   :  { %v1502_v50 = vmul.f32 %v1495_v26, %v3161_v24  ;;  %v1503_v1 = vmul.f32 %v1500_v2, %v3161_v24 }
0x112c   :  { %v1645_v6 = vpop.permute.xlu0 %1644  ;;  %v1553_v13 = vpop.permute.xlu1 %1552 }
0x112d   :  { %v1560_v61 = vmul.f32 %v1553_v13, %v3157_v22  ;;  %2626 = vmatpush3.bf16.msra.mxu1 %v1645_v6 }
0x112e   :  { %2637 = vmatprep.subr.bf16.mxu1 %v2918_v47 }
0x112f   :  { %v1562_v44 = vadd.f32 %v1560_v61, %v1502_v50 }
0x1130   :  { %v1558_v0 = vpop.permute.xlu1 %1557 }
0x1131   :  { %v1578_v53 = vsub.f32 %v1576_v14, %v1562_v44  ;;  %v1561_v19 = vmul.f32 %v1558_v0, %v3157_v22 }
0x1133   :  { %v1580_v31 = vmul.f32 1.442695, %v1578_v53  ;;  %v1563_v54 = vadd.f32 %v1561_v19, %v1503_v1 }
0x1135   :  { %2783 = vpow2.f32 %v1580_v31  ;;  %v1579_v15 = vsub.f32 %v1577_v45, %v1563_v54  ;;  %v2375_v31 = vld [vmem:[#allocation5 + $0xd] ss:$0 sm:$0xff] }
0x1137   :  { %v1582_v32 = vmul.f32 1.442695, %v1579_v15 }
0x1139   :  { %2785 = vpow2.f32 %v1582_v32 }
0x113f   :  { %v2784_v35 = vpop.eup %2783 }
0x1140   :  { %v1584_v36 = vadd.f32 0.0001, %v2784_v35 }
0x1142   :  { %v1586_v24 = vmul.f32 0.15075567, %v1584_v36 }
0x1143   :  { %v2786_v30 = vpop.eup %2785 }
0x1144   :  { %v1585_v42 = vadd.f32 0.0001, %v2786_v30 }
0x1146   :  { %v1587_v39 = vmul.f32 0.15075567, %v1585_v42 }
0x1148   :  { %v1591_v41 = vpack.c.bf16 %v1587_v39, %v1586_v24 }
0x114a   :  { %2620 = vmatpush3.bf16.xpose.msra.mxu0 %v1591_v41 }
0x114b   :  { %2631 = vmatprep.subr.bf16.mxu0 %v2918_v47 }
0x1151   :  { %2622 = vmatmul.mubr.bf16.vlgmr.msra.gmra.mrb[36].mxu0 %v1590_v11 }
0x1152   :  { %2632 = vmatpush3.bf16.xpose.msra.mxu0 %v1591_v41  ;;  %2633 = vmatprep.mubr.msk.bf16.mxu0 %vm2919_vm1, %v2918_v47 }
0x1153   :  { %2643 = vmatprep.subr.bf16.mxu0 %v2918_v47 }
0x1159   :  { %2634 = vmatmul.mubr.bf16.vlgmr.msra.gmra.mrb[40].mxu0 %v1701_v12 }
0x115a   :  { %2647 = vmatprep.mubr.msk.bf16.mxu0 %vm2919_vm1, %v2918_v47 }
0x1224   :  { %v1626_v22 = vpop.f32.mrb[36].mxu0 }
0x1225   :  { %v1633_v5 = vmul.f32 %v1626_v22, %v3194_v52  ;;  %v2623_v7 = vpop.f32.mrb[37].mxu0 }
0x1226   :  { %v1629_v23 = vpop.f32.mrb[38].mxu0 }
0x1227   :  { %v1634_v14 = vmul.f32 %v1629_v23, %v3196_v3  ;;  %v2624_v17 = vpop.f32.mrb[39].mxu0  ;;  %v1635_v45 = vsel %vm647_vm5, %v1633_v5, 0.0 }
0x1228   :  { %1636 = vadd.xlane.f32.xlu1 %v1635_v45  ;;  %v2731_v17 = vld [vmem:[#allocation2 + $0xb0] sm:$0xff]   ;;  %v2732_v45 = vld [vmem:[#allocation2 + $0xb8] sm:$0xff]  }
0x1229   :  { %v1641_v34 = vpack.c.bf16 %v1634_v14, %v1633_v5  ;;  %v1638_v46 = vsel %vm647_vm5, %v1634_v14, 0.0 }
0x122a   :  { %1639 = vadd.xlane.f32.xlu0 %v1638_v46 }
0x122b   :  { %2628 = vmatmul.mubr.msk.bf16.vlgmr.msra.gmra.mrb[32].mxu1 %vm647_vm5, %v1641_v34 }
0x122c   :  { %2638 = vmatpush3.bf16.msra.mxu1 %v1645_v6  ;;  %v1736_v48 = vpop.f32.mrb[40].mxu0  ;;  %2639 = vmatprep.mubr.msk.bf16.mxu1 %vm2919_vm1, %v2918_v47 }
0x122d   :  { %v1743_v27 = vmul.f32 %v1736_v48, %v3194_v52  ;;  %v2635_v37 = vpop.f32.mrb[41].mxu0  ;;  %2651 = vmatprep.subr.bf16.mxu1 %v2918_v47  ;;  %v2729_v52 = vld [vmem:[#allocation2 + $0xa0] sm:$0xff]  }
0x122e   :  { %v1739_v49 = vpop.f32.mrb[42].mxu0  ;;  %2644 = vmatpush3.bf16.msra.mxu0 %v2729_v52 }
0x122f   :  { %v1744_v21 = vmul.f32 %v1739_v49, %v3196_v3  ;;  %v2636_v55 = vpop.f32.mrb[43].mxu0  ;;  %v1745_v56 = vsel %vm647_vm5, %v1743_v27, 0.0  ;;  %2645 = vmatprep.subr.bf16.mxu0 %v2918_v47 }
0x1230   :  { %1746 = vadd.xlane.f32.xlu0 %v1745_v56  ;;  %v2376_v55 = vld [vmem:[#allocation5 + $0xe] ss:$0 sm:$0xff] }
0x1231   :  { %v1751_v43 = vpack.c.bf16 %v1744_v21, %v1743_v27  ;;  %v1748_v33 = vsel %vm647_vm5, %v1744_v21, 0.0 }
0x1232   :  { %1749 = vadd.xlane.f32.xlu1 %v1748_v33  ;;  %2646 = vmatpush3.bf16.msra.mxu0 %v2730_v51  ;;  %v2377_v51 = vld [vmem:[#allocation5 + $0xf] ss:$0 sm:$0xff] }
0x1233   :  { %2640 = vmatmul.mubr.msk.bf16.vlgmr.msra.gmra.mrb[36].mxu1 %vm647_vm5, %v1751_v43  ;;  %2659 = vmatprep.subr.bf16.mxu0 %v2918_v47 }
0x1234   :  { %2655 = vmatprep.mubr.msk.bf16.mxu1 %vm2919_vm1, %v2918_v47  ;;  %2652 = vmatpush3.bf16.msra.mxu1 %v2731_v17 }
0x1235   :  { %2653 = vmatprep.subr.bf16.mxu1 %v2918_v47 }
0x1238   :  { %2654 = vmatpush3.bf16.msra.mxu1 %v2732_v45 }
0x1239   :  { %2679 = vmatprep.subr.bf16.mxu1 %v2918_v47 }
0x12b5   :  { %v1637_v20 = vpop.xlane.xlu1 %1636 }
0x12b6   :  { %2787 = vrcp.f32 %v1637_v20 }
0x12b7   :  { %v1640_v3 = vpop.xlane.xlu0 %1639 }
0x12b8   :  { %2789 = vrcp.f32 %v1640_v3 }
0x12bd   :  { %v1747_v57 = vpop.xlane.xlu0 %1746 }
0x12be   :  { %2791 = vrcp.f32 %v1747_v57 }
0x12bf   :  { %v1750_v58 = vpop.xlane.xlu1 %1749 }
0x12c0   :  { %2793 = vrcp.f32 %v1750_v58  ;;  %v2788_v16 = vpop.eup %2787 }
0x12c2   :  { %v2790_v18 = vpop.eup %2789 }
0x12c8   :  { %v2792_v28 = vpop.eup %2791 }
0x12ca   :  { %v2794_v12 = vpop.eup %2793 }
0x12fe   :  { %v1684_v38 = vpop.f32.mrb[32].mxu1 }
0x12ff   :  { %v2629_v40 = vpop.f32.mrb[33].mxu1  ;;  %v1693_v25 = vmul.f32 %v2788_v16, %v1684_v38  ;;  %v2733_v38 = vld [vmem:[#allocation2 + $0xc0] sm:$0xff]  }
0x1300   :  { %v1687_v60 = vpop.f32.mrb[34].mxu1  ;;  %v2734_v40 = vld [vmem:[#allocation2 + $0xc8] sm:$0xff]   ;;  %v2737_v16 = vld [vmem:[#allocation2 + $0xe0] sm:$0xff]  }
0x1301   :  { %v2630_v4 = vpop.f32.mrb[35].mxu1  ;;  %v1694_v9 = vmul.f32 %v2790_v18, %v1687_v60  ;;  %v1695_v26 = vmul.f32 %v1693_v25, %v3216_v62  ;;  %v2735_v60 = vld [vmem:[#allocation2 + $0xd0] sm:$0xff]   ;;  %v2738_v18 = vld [vmem:[#allocation2 + $0xe8] sm:$0xff]  }
0x1302   :  { %v2736_v4 = vld [vmem:[#allocation2 + $0xd8] sm:$0xff]   ;;  %v2739_v25 = vld [vmem:[#allocation2 + $0xf0] sm:$0xff]  }
0x1303   :  { %v1696_v61 = vmul.f32 %v1694_v9, %v3216_v62 }
0x1306   :  { %v1789_v8 = vpop.f32.mrb[36].mxu1 }
0x1307   :  { %v1798_v10 = vmul.f32 %v2792_v28, %v1789_v8  ;;  %v2641_v11 = vpop.f32.mrb[37].mxu1  ;;  %v2740_v28 = vld [vmem:[#allocation2 + $0xf8] sm:$0xff]   ;;  %v2378_v8 = vld [vmem:[#allocation5 + $0x10] ss:$0 sm:$0xff] }
0x1308   :  { %v1792_v2 = vpop.f32.mrb[38].mxu1 }
0x1309   :  { %v1800_v6 = vmul.f32 %v1798_v10, %v3219_v63  ;;  %v1799_v13 = vmul.f32 %v2794_v12, %v1792_v2  ;;  %v2642_v50 = vpop.f32.mrb[39].mxu1 }
0x130b   :  { %v1802_v44 = vadd.f32 %v1800_v6, %v1695_v26  ;;  %v1801_v0 = vmul.f32 %v1799_v13, %v3219_v63 }
0x130d   :  { %v1803_v1 = vadd.f32 %v1801_v0, %v1696_v61 }
0x130f   :  { %v1808_v53 = vpack.c.bf16 %v1803_v1, %v1802_v44 }
0x1311   :  { %2648 = vmatmul.mubr.msk.bf16.vlgmr.msra.gmra.mrb[44].mxu0 %vm84_vm0, %v1808_v53 }
0x1312   :  { %2675 = vmatprep.mubr.msk.bf16.mxu0 %vm2919_vm1, %v2918_v47  ;;  %2660 = vmatpush3.bf16.msra.mxu0 %v2733_v38 }
0x1313   :  { %2661 = vmatprep.subr.bf16.mxu0 %v2918_v47 }
0x1316   :  { %2662 = vmatpush3.bf16.msra.mxu0 %v2734_v40 }
0x1317   :  { %2663 = vmatprep.subr.bf16.mxu0 %v2918_v47 }
0x131a   :  { %2664 = vmatpush3.bf16.msra.mxu0 %v2735_v60 }
0x131b   :  { %2665 = vmatprep.subr.bf16.mxu0 %v2918_v47 }
0x131e   :  { %2666 = vmatpush3.bf16.msra.mxu0 %v2736_v4  ;;  %v75_v4 = vld [vmem:[%s3494_s1 + $0x8] sm:$0xff] }
0x131f   :  { %2667 = vmatprep.subr.bf16.mxu0 %v2918_v47 }
0x1322   :  { %2668 = vmatpush3.bf16.msra.mxu0 %v2737_v16 }
0x1323   :  { %2669 = vmatprep.subr.bf16.mxu0 %v2918_v47 }
0x1326   :  { %2670 = vmatpush3.bf16.msra.mxu0 %v2738_v18 }
0x1327   :  { %2671 = vmatprep.subr.bf16.mxu0 %v2918_v47 }
0x132a   :  { %2672 = vmatpush3.bf16.msra.mxu0 %v2739_v25  ;;  %v74_v25 = vld [vmem:[%s3494_s1] sm:$0xff]  ;;  %s2924_s1 = smov [#allocation8]  }
0x132b   :  { %2673 = vmatprep.subr.bf16.mxu0 %v2918_v47  ;;  %s2313_s15 = sshll.u32 %s2924_s1, 4  ;;  %s2314_s15 = int_to_ptr.vmem [resolvable:$true] %s2313_s15 }
0x132c   :  { %s2883_s16 = scalar_lea.vmem %s2314_s15, 32  ;;  %p2888_p11 = scmp.lt.s32.totalorder %s2314_s15, %s2314_s15 }
0x132d   :  { %p2884_p10 = scmp.ne.s32.totalorder %s2314_s15, %s2883_s16  ;;  %p2889_p12 = scmp.lt.s32.totalorder %s2883_s16, %s2883_s16 }
0x132e   :  { %2674 = vmatpush3.bf16.msra.mxu0 %v2740_v28 }
0x132f   :  { %p2890_p13 = por %p2889_p12, %p2888_p11 }
0x1331   :  { %p2891_p0 = pnand %p2890_p13, %p2884_p10 }
0x13e4   :  { %v1858_v19 = vpop.f32.mrb[44].mxu0 }
0x13e5   :  { %v1865_v54 = vadd.f32 %v1858_v19, %v3262_v29  ;;  %v2649_v15 = vpop.f32.mrb[45].mxu0 }
0x13e6   :  { %v1861_v32 = vpop.f32.mrb[46].mxu0 }
0x13e7   :  { %v3430_v35 = vadd.f32 %v2375_v31, %v1865_v54  ;;  %v1866_v62 = vadd.f32 %v1861_v32, %v3265_v59  ;;  %v2650_v36 = vpop.f32.mrb[47].mxu0 }
0x13e9   :  { %v3433_v30 = vadd.f32 %v2375_v31, %v1866_v62  ;;  %v1876_v63 = vsel %vm84_vm0, %v3430_v35, 0.0 }
0x13ea   :  { %1877 = vadd.xlane.f32.xlu0 %v1876_v63 }
0x13eb   :  { %v1879_v42 = vsel %vm84_vm0, %v3433_v30, 0.0 }
0x13ec   :  { %1880 = vadd.xlane.f32.xlu1 %v1879_v42 }
0x1477   :  { %v1878_v24 = vpop.xlane.xlu0 %1877 }
0x1478   :  { %v1882_v39 = vmul.f32 0.03125, %v1878_v24 }
0x1479   :  { %v1881_v29 = vpop.xlane.xlu1 %1880 }
0x147a   :  { %v1884_v41 = vsub.f32 %v3430_v35, %v1882_v39  ;;  %v1883_v22 = vmul.f32 0.03125, %v1881_v29  ;;  %v2741_v29 = vld [vmem:[#allocation2 + $0x100] sm:$0xff]  }
0x147c   :  { %v1885_v5 = vsub.f32 %v3433_v30, %v1883_v22  ;;  %v1886_v59 = vmul.f32 %v1884_v41, %v1884_v41 }
0x147e   :  { %v1888_v7 = vsel %vm84_vm0, %v1886_v59, 0.0  ;;  %v1887_v23 = vmul.f32 %v1885_v5, %v1885_v5 }
0x147f   :  { %1889 = vadd.xlane.f32.xlu0 %v1888_v7  ;;  %v2390_v7 = vld [vmem:[#allocation5 + $0x11] ss:$0 sm:$0xff] }
0x1480   :  { %v1891_v14 = vsel %vm84_vm0, %v1887_v23, 0.0 }
0x1481   :  { %1892 = vadd.xlane.f32.xlu1 %v1891_v14 }
0x150c   :  { %v1890_v34 = vpop.xlane.xlu0 %1889 }
0x150d   :  { %v1894_v46 = vmul.f32 0.03125, %v1890_v34 }
0x150e   :  { %v1893_v48 = vpop.xlane.xlu1 %1892 }
0x150f   :  { %v1896_v27 = vadd.f32 1e-05, %v1894_v46  ;;  %v1895_v37 = vmul.f32 0.03125, %v1893_v48  ;;  %v2391_v48 = vld [vmem:[#allocation5 + $0x12] ss:$0 sm:$0xff] }
0x1511   :  { %2795 = vrsqrt.f32 %v1896_v27  ;;  %v1897_v49 = vadd.f32 1e-05, %v1895_v37 }
0x1513   :  { %2797 = vrsqrt.f32 %v1897_v49 }
0x151b   :  { %v2796_v21 = vpop.eup %2795 }
0x151c   :  { %v1900_v56 = vmul.f32 %v2796_v21, %v1884_v41  ;;  %v2742_v41 = vld [vmem:[#allocation2 + $0x108] sm:$0xff]  }
0x151d   :  { %v2798_v43 = vpop.eup %2797 }
0x151e   :  { %v1906_v33 = vmul.f32 %v2376_v55, %v1900_v56  ;;  %v1901_v52 = vmul.f32 %v2798_v43, %v1885_v5  ;;  %v2395_v43 = vld [vmem:[#allocation5 + $0x13] ss:$0 sm:$0xff] }
0x1520   :  { %v1907_v3 = vmul.f32 %v2376_v55, %v1901_v52  ;;  %v1912_v20 = vadd.f32 %v2377_v51, %v1906_v33 }
0x1522   :  { %v1913_v57 = vadd.f32 %v2377_v51, %v1907_v3 }
0x1524   :  { %v1918_v58 = vpack.c.bf16 %v1913_v57, %v1912_v20 }
0x1526   :  { %2656 = vmatmul.mubr.msk.bf16.vlgmr.msra.gmra.mrb[40].mxu1 %vm84_vm0, %v1918_v58 }
0x1527   :  { %2683 = vmatprep.mubr.msk.bf16.mxu1 %vm2919_vm1, %v2918_v47  ;;  %2680 = vmatpush3.bf16.msra.mxu1 %v2741_v29 }
0x1528   :  { %2681 = vmatprep.subr.bf16.mxu1 %v2918_v47 }
0x152b   :  { %2682 = vmatpush3.bf16.msra.mxu1 %v2742_v41 }
0x152c   :  { %2687 = vmatprep.subr.bf16.mxu1 %v2918_v47 }
0x15f9   :  { %v1973_v9 = vpop.f32.mrb[40].mxu1 }
0x15fa   :  { %v1974_v10 = vadd.f32 %v2378_v8, %v1973_v9  ;;  %v2657_v11 = vpop.f32.mrb[41].mxu1 }
0x15fb   :  { %v1976_v12 = vpop.f32.mrb[42].mxu1 }
0x15fc   :  { %v1980_v2 = vmul.f32 %v1974_v10, %v1974_v10  ;;  %v1977_v26 = vadd.f32 %v2378_v8, %v1976_v12  ;;  %v2658_v6 = vpop.f32.mrb[43].mxu1 }
0x15fe   :  { %v1982_v13 = vmul.f32 %v1980_v2, %v1974_v10  ;;  %v1981_v50 = vmul.f32 %v1977_v26, %v1977_v26 }
0x1600   :  { %v1984_v61 = vmul.f32 0.044715, %v1982_v13  ;;  %v1983_v44 = vmul.f32 %v1981_v50, %v1977_v26 }
0x1602   :  { %v1986_v0 = vadd.f32 %v1984_v61, %v1974_v10  ;;  %v1985_v1 = vmul.f32 0.044715, %v1983_v44  ;;  %v2815_v61 = vld [vmem:[#allocation7 + $0x36] sm:$0xff] }
0x1604   :  { %v1988_v53 = vmul.f32 0.7978846, %v1986_v0  ;;  %v1987_v19 = vadd.f32 %v1985_v1, %v1977_v26  ;;  %v2816_v0 = vld [vmem:[#allocation7 + $0x3e] sm:$0xff] }
0x1606   :  { %2799 = vtanh.f32 %v1988_v53  ;;  %v1989_v31 = vmul.f32 0.7978846, %v1987_v19 }
0x1608   :  { %2801 = vtanh.f32 %v1989_v31 }
0x1610   :  { %v2800_v54 = vpop.eup %2799 }
0x1611   :  { %v1992_v15 = vadd.f32 1.0, %v2800_v54 }
0x1612   :  { %v2802_v32 = vpop.eup %2801 }
0x1613   :  { %v1994_v62 = vmul.f32 0.5, %v1992_v15  ;;  %v1993_v36 = vadd.f32 1.0, %v2802_v32 }
0x1615   :  { %v1995_v63 = vmul.f32 0.5, %v1993_v36  ;;  %v1996_v42 = vmul.f32 %v1994_v62, %v1974_v10 }
0x1617   :  { %v1997_v24 = vmul.f32 %v1995_v63, %v1977_v26 }
0x1619   :  { %v2014_v39 = vpack.c.bf16 %v1997_v24, %v1996_v42 }
0x161b   :  { %2676 = vmatmul.mubr.bf16.vlgmr.msra.gmra.mrb[48].mxu0 %v2014_v39 }
0x16ee   :  { %v2097_v22 = vpop.f32.mrb[48].mxu0 }
0x16ef   :  { %v2104_v5 = vadd.f32 %v2097_v22, %v3430_v35  ;;  %v2677_v59 = vpop.f32.mrb[49].mxu0 }
0x16f0   :  { %v2100_v23 = vpop.f32.mrb[50].mxu0 }
0x16f1   :  { %v2105_v14 = vadd.f32 %v2100_v23, %v3433_v30  ;;  %v2678_v17 = vpop.f32.mrb[51].mxu0  ;;  %v3459_v45 = vadd.f32 %v2390_v7, %v2104_v5 }
0x16f3   :  { %v3461_v34 = vadd.f32 %v2390_v7, %v2105_v14 }
0x16f5   :  { %v2117_v46 = vpack.c.bf16 %v3461_v34, %v3459_v45 }
0x16f7   :  { %2684 = vmatmul.mubr.msk.bf16.vlgmr.msra.gmra.mrb[44].mxu1 %vm84_vm0, %v2117_v46 }
0x16f8   :  { %2689 = vmatprep.mubr.msk.bf16.mxu1 %vm2919_vm1, %v2918_v47  ;;  %v2396_v47 = vld [vmem:[#allocation5 + $0x14] ss:$0 sm:$0xff] }
0x17ca   :  { %v2172_v35 = vpop.f32.mrb[44].mxu1 }
0x17cb   :  { %v2173_v27 = vadd.f32 %v2391_v48, %v2172_v35  ;;  %v2685_v37 = vpop.f32.mrb[45].mxu1 }
0x17cc   :  { %v2175_v49 = vpop.f32.mrb[46].mxu1 }
0x17cd   :  { %v2176_v21 = vadd.f32 %v2391_v48, %v2175_v49  ;;  %v2686_v30 = vpop.f32.mrb[47].mxu1  ;;  %2803 = vtanh.f32 %v2173_v27  ;;  %v71_v48 = vld [vmem:[#allocation7 + $0x34] sm:$0x3] }
0x17ce   :  { %v2260_v27 = vpack.c.bf16 %v71_v48, %v71_v48 }
0x17cf   :  { %2805 = vtanh.f32 %v2176_v21 }
0x17d7   :  { %v2804_v55 = vpop.eup %2803 }
0x17d8   :  { %v2186_v51 = vmul.f32 %v2804_v55, %v2395_v43 }
0x17d9   :  { %v2806_v56 = vpop.eup %2805 }
0x17da   :  { %v2187_v33 = vmul.f32 %v2806_v56, %v2395_v43  ;;  %v2188_v3 = vsel %vm84_vm0, %v2186_v51, 0.0 }
0x17dc   :  { %v2191_v52 = vsel %vm84_vm0, %v2187_v33, 0.0 }
0x17dd   :  { %2192 = vadd.xlane.f32.xlu0 %v2191_v52 }
0x17e1   :  { %2189 = vadd.xlane.f32.xlu0 %v2188_v3 }
0x186a   :  { %v2193_v20 = vpop.xlane.xlu0 %2192 }
0x186b   :  { %v2200_v57 = vadd.f32 %v2396_v47, %v2193_v20 }
0x186d   :  { %v2203_v58 = vmul.f32 1.442695, %v2200_v57 }
0x186e   :  { %v2190_v38 = vpop.xlane.xlu0 %2189 }
0x186f   :  { %2807 = vpow2.f32 %v2203_v58  ;;  %v2199_v40 = vadd.f32 %v2396_v47, %v2190_v38 }
0x1871   :  { %v2201_v60 = vmul.f32 1.442695, %v2199_v40 }
0x1873   :  { %2809 = vpow2.f32 %v2201_v60 }
0x1879   :  { %v2808_v16 = vpop.eup %2807 }
0x187a   :  { %v2206_v18 = vmul.f32 %v2808_v16, %v75_v4 }
0x187c   :  { %v2219_v28 = vsel %vm2207_vm6, %v2206_v18, 0.0 }
0x187d   :  { %v2810_v8 = vpop.eup %2809  ;;  %v2220_v9 = vrot.slane %v2219_v28, 4 }
0x187e   :  { %v2205_v10 = vmul.f32 %v2810_v8, %v74_v25 }
0x187f   :  { %v2221_v11 = vadd.f32 %v2220_v9, %v2219_v28 }
0x1880   :  { %v2208_v12 = vsel %vm2207_vm6, %v2205_v10, 0.0 }
0x1881   :  { %v2222_v2 = vrot.slane %v2221_v11, 2  ;;  %v2209_v53 = vrot.slane %v2208_v12, 4 }
0x1883   :  { %v2223_v26 = vadd.f32 %v2222_v2, %v2221_v11  ;;  %v2210_v19 = vadd.f32 %v2209_v53, %v2208_v12 }
0x1885   :  { %v2224_v6 = vrot.slane %v2223_v26, 1  ;;  %v2211_v31 = vrot.slane %v2210_v19, 2 }
0x1887   :  { %v2225_v13 = vadd.f32 %v2224_v6, %v2223_v26  ;;  %v2212_v54 = vadd.f32 %v2211_v31, %v2210_v19 }
0x1889   :  { %2227 = vrot.lane.b32.xlu1 %v2225_v13, %s2923_s14  ;;  %v2213_v15 = vrot.slane %v2212_v54, 1 }
0x188b   :  { %v2214_v32 = vadd.f32 %v2213_v15, %v2212_v54 }
0x188d   :  { %v2216_v62 = vmul.f32 %v2816_v0, %v2214_v32  ;;  %v2215_v36 = vmul.f32 %v2815_v61, %v2214_v32 }
0x18fb   :  { %v2228_v50 = vpop.permute.xlu1 %2227 }
0x18fc   :  { %v2230_v44 = vmul.f32 %v2815_v61, %v2228_v50  ;;  %v2231_v1 = vmul.f32 %v2816_v0, %v2228_v50 }
0x18fe   :  { %2236 = vrot.lane.b32.xlu1 %v2231_v1, %s2922_s4  ;;  %2234 = vrot.lane.b32.xlu0 %v2230_v44, %s2922_s4 }
0x1970   :  { %v2237_v63 = vpop.permute.xlu1 %2236  ;;  %v2235_v42 = vpop.permute.xlu0 %2234 }
0x1971   :  { %v2241_v24 = vadd.f32 %v2237_v63, %v2216_v62  ;;  %v2240_v39 = vadd.f32 %v2235_v42, %v2215_v36 }
0x1973   :  { %v2242_v29 = vadd.f32 1e-08, %v2240_v39  ;;  %v2243_v41 = vadd.f32 1e-08, %v2241_v24 }
0x1975   :  { %2811 = vrcp.f32 %v2242_v29 }
0x1976   :  { %2813 = vrcp.f32 %v2243_v41 }
0x197f   :  { %v2812_v22 = vpop.eup %2811 }
0x1980   :  { %v2246_v5 = vmul.f32 %v2812_v22, %v2205_v10  ;;  %v2814_v59 = vpop.eup %2813 }
0x1981   :  { %v2247_v7 = vmul.f32 %v2814_v59, %v2206_v18 }
0x1982   :  { %2250 = vperm.xlu1 %2708, %v2246_v5  }
0x1986   :  { %2255 = vperm.xlu1 %2708, %v2247_v7  }
0x1a01   :  { %v2251_v23 = vpop.permute.xlu1 %2250 }
0x1a02   :  { %v2258_v17 = vmul.f32 %v2251_v23, %v3459_v45 }
0x1a05   :  { %v2256_v14 = vpop.permute.xlu1 %2255 }
0x1a06   :  { %v2259_v46 = vmul.f32 %v2256_v14, %v3461_v34 }
0x1a08   :  { %v2261_v35 = vpack.c.bf16 %v2259_v46, %v2258_v17 }
0x1a0a   :  { %2688 = vmatpush3.bf16.msra.mxu1 %v2261_v35 }
0x1a0d   :  { %2690 = vmatmul.mubr.msk.bf16.vlgmr.msra.gmra.mrb[48].mxu1 %vm647_vm5, %v2260_v27 }
0x1ae0   :  { %v2299_v37 = vpop.f32.mrb[48].mxu1 }
0x1ae1   :  { %v2691_v49 = vpop.f32.mrb[49].mxu1  ;;  %2306 = vst.msk [vmem:[#allocation8] sm:$0x3] %vm2305_vm7, %v2299_v37 }
0x1ae2   :  { %v2302_v21 = vpop.f32.mrb[50].mxu1 }
0x1ae3   :  { %2894 = shalt.err (!%p2891_p0)
}
0x1ae4   :  { %s2895_s18 = scalar_lea.hbm %s3498_s5, 32 }
0x1ae5   :  { %p2896_p1 = scmp.ne.s32.totalorder %s3498_s5, %s2895_s18  ;;  %p2899_p2 = scmp.lt.u32.totalorder %s2895_s18, %s3498_s5 }
0x1ae7   :  { %p2901_p3 = pnand %p2899_p2, %p2896_p1 }
0x1ae9   :  { %2904 = shalt.err (!%p2901_p3)
}
0x1aea   :  { %2316 = dma.vmem_to_hbm [thread:$0]  %s2314_s15, 32, %s3498_s5, [#allocation4]   ;;  %v2692_v45 = vpop.f32.mrb[51].mxu1 }
0x1aeb   :  { %2909 = dma.done.wait [#allocation4], 32  }
0x1aec   :  { %2910 = vsyncadd [#allocation4], 4294967264 }
0x1aed   :  { %2320 = vsyncpa [#allocation3], 1 }
0x1aee   :  { %2321 = vsyncpa [#allocation6], 1 }
0x1aef   :  { %2322 = vsyncpa [#allocation4], 1 }

</bundles_post_ra>
